<compile_context>
chip_gen: v6e
topology: v6e:2x2x1
jax: 0.10.0
libtpu: 0.0.40
codegen_flags: <defaults>
</compile_context>

<pallas_src>
import math

import jax
import jax.numpy as jnp
from jax.experimental import pallas as pl
from jax.experimental.pallas import tpu as pltpu


def _default_out_dtype():
    """bf16 on v5e (write-BW / vst-slot bound), f32 elsewhere."""
    try:
        kind = jax.devices()[0].device_kind.lower()
    except Exception:  # pragma: no cover - conservative fallback
        return jnp.float32
    if ("v5 lite" in kind) or ("v5e" in kind) or ("v5lite" in kind):
        return jnp.bfloat16
    return jnp.float32


def _make_kernel(r_max, r_min, pack, n_basis, n_hidden, n_valid_rows):
    alpha = 5.0 / (r_max - r_min)
    w_pi = math.pi / r_max

    def kernel(d_ref, means_ref, betas_ref, w_ref, b_ref, o_ref):
        tm = d_ref.shape[0]
        d = d_ref[...]                                     # (tm, pack) f32
        # Row guard for the partial last block: push out-of-range rows beyond
        # the cutoff so they compute finite zeros (their writeback is masked
        # by Pallas anyway, this just keeps the math benign/deterministic).
        row = (jax.lax.broadcasted_iota(jnp.int32, d.shape, 0)
               + pl.program_id(0) * tm)
        d = jnp.where(row < n_valid_rows, d, 2.0 * r_max)

        means = means_ref[...]                             # (1, K) f32
        betas = betas_ref[...]                             # (1, K) f32
        w = w_ref[...]                                     # (pack*K, pack*H) bf16

        acc = jnp.zeros((tm, pack * n_hidden), jnp.float32)
        for j in range(pack):                              # static, tiny unroll
            d_j = jax.lax.slice_in_dim(d, j, j + 1, axis=1)        # (tm, 1)
            # cosine cutoff: 0.5*(cos(pi*d/r_max)+1), zero beyond r_max
            cut_j = jnp.where(d_j < r_max,
                              0.5 * (jnp.cos(d_j * w_pi) + 1.0), 0.0)
            # exp-normal smearing
            ed_j = jnp.exp(alpha * (r_min - d_j))                  # (tm, 1)
            diff = ed_j - means                                    # (tm, K)
            rbf = cut_j * jnp.exp(-betas * diff * diff)            # (tm, K) f32
            # interaction slab for this packed segment (rows j*K:(j+1)*K of
            # the block-diagonal weight) -> lanes j*H:(j+1)*H of the output.
            w_j = jax.lax.slice_in_dim(w, j * n_basis, (j + 1) * n_basis,
                                       axis=0)                     # (K, pack*H)
            acc = acc + jnp.dot(rbf.astype(jnp.bfloat16), w_j,
                                preferred_element_type=jnp.float32)
        o_ref[...] = (acc + b_ref[...]).astype(o_ref.dtype)

    return kernel


def tensornet_core_forward(d, means, betas, weight, bias, *, r_max, r_min,
                           tile_pairs=4096, out_dtype=None):
    """d: (N, 1) pair distances; means/betas: (1, K); weight: (K, H); bias: (1, H).

    Returns a (N, H) array.  out_dtype=None -> bf16 on v5e, f32 elsewhere.
    """
    r_max = float(r_max)
    r_min = float(r_min)
    n_pairs = d.shape[0]
    k = means.shape[1]
    h = weight.shape[1]
    if out_dtype is None:
        out_dtype = _default_out_dtype()

    # Lane-dense output packing: put `pack` pairs side by side on the lane
    # axis so the output block is 128 lanes wide (unmasked stores, half the
    # output VMEM).  Falls back to pack=1 when it does not apply.
    pack = 128 // h if (h <= 128 and 128 % h == 0) else 1
    if pack > 1 and n_pairs % pack != 0:
        # TODO(synk): could pad d by < pack rows; keep the exact-output path simple.
        pack = 1
    rows = n_pairs // pack

    d2 = d.reshape(rows, pack)                               # free bitcast reshape
    # Block-diagonal interaction weight (exactly W in each diagonal block).
    w_bd = jnp.kron(jnp.eye(pack, dtype=weight.dtype), weight).astype(jnp.bfloat16)
    b_p = jnp.tile(bias, (1, pack))                          # (1, pack*H) f32

    # ---- tile selection ----------------------------------------------------
    # Per-step overhead ~0.35us -> want >= ~1 MiB of output per step, but:
    #  * keep grid >= 2 so dimension_semantics=("parallel",) can shard the
    #    pair axis across v7x's two TensorCores,
    #  * cap tile_rows at 4096 so the double-buffered output + lane-padded
    #    distance blocks stay ~9 MiB (under the 32 MiB scoped VMEM default).
    req = max(8, min(int(tile_pairs) // pack, 4096))
    req = (req // 8) * 8
    if rows > 8:
        req = min(req, ((pl.cdiv(rows, 2) + 7) // 8) * 8)    # enforce grid >= 2
    tile_rows = rows if req >= rows else req
    grid = (pl.cdiv(rows, tile_rows),)

    kernel = _make_kernel(r_max, r_min, pack, k, h, rows)

    out_itemsize = jnp.dtype(out_dtype).itemsize
    cost = pl.CostEstimate(
        flops=2 * n_pairs * k * (pack * h),
        transcendentals=n_pairs * (k + 2),
        bytes_accessed=int(n_pairs * 4 + n_pairs * h * out_itemsize
                           + (pack * k) * (pack * h) * 2 + 2 * k * 4
                           + pack * h * 4),
    )

    out_packed = pl.pallas_call(
        kernel,
        out_shape=jax.ShapeDtypeStruct((rows, pack * h), out_dtype),
        grid_spec=pl.GridSpec(
            grid=grid,
            in_specs=[
                pl.BlockSpec((tile_rows, pack), lambda i: (i, 0)),     # distances
                pl.BlockSpec((1, k), lambda i: (0, 0)),                # rbf means
                pl.BlockSpec((1, k), lambda i: (0, 0)),                # rbf betas
                pl.BlockSpec((pack * k, pack * h), lambda i: (0, 0)),  # W (bf16, blkdiag)
                pl.BlockSpec((1, pack * h), lambda i: (0, 0)),         # bias
            ],
            out_specs=pl.BlockSpec((tile_rows, pack * h), lambda i: (i, 0)),
        ),
        compiler_params=pltpu.CompilerParams(
            dimension_semantics=("parallel",)),   # shards pairs across TCs on v7x
        cost_estimate=cost,
    )(d2, means, betas, w_bd, b_p)

    # Row-major (rows, pack*H) -> (N, H) is a free bitcast reshape (no copy).
    return out_packed.reshape(n_pairs, h)


def reference_forward(d, means, betas, weight, bias, *, r_max, r_min):
    """Pure-JAX reference matching the kernel's numerics (bf16 MXU inputs)."""
    alpha = 5.0 / (r_max - r_min)
    cut = jnp.where(d < r_max, 0.5 * (jnp.cos(d * (math.pi / r_max)) + 1.0), 0.0)
    ed = jnp.exp(alpha * (r_min - d))
    rbf = cut * jnp.exp(-betas * (ed - means) ** 2)
    out = jnp.dot(rbf.astype(jnp.bfloat16), weight.astype(jnp.bfloat16),
                  preferred_element_type=jnp.float32)
    return out + bias


if __name__ == "__main__":
    # Module hyperparameters (radial_max_distance, radial_min_distance, n_rbf)
    r_max = 5.0          # "angstrom"
    r_min = 0.0
    n_rbf = 32           # number_of_radial_basis_functions
    hidden = 64          # interaction feature width

    key = jax.random.PRNGKey(0)
    k_d1, k_d2, k_w, k_b = jax.random.split(key, 4)

    # exp-normal RBF parameters (deterministic, as in TensorNet init)
    start = math.exp(r_min - r_max)
    means = jnp.linspace(start, 1.0, n_rbf, dtype=jnp.float32).reshape(1, n_rbf)
    betas = jnp.full((1, n_rbf), (2.0 / n_rbf * (1.0 - start)) ** -2,
                     dtype=jnp.float32)

    # interaction (linear) parameters — deterministic synthetic init
    weight = jax.random.normal(k_w, (n_rbf, hidden), jnp.float32) / math.sqrt(n_rbf)
    bias = jax.random.normal(k_b, (1, hidden), jnp.float32) * 0.01

    # Case 1: even pair count -> lane-dense packed path (pack=2, 128-lane
    # output blocks); 150 packed rows with 80-row tiles exercises the
    # non-divisible grid (partial last block), grid >= 2 for v7x.
    n1 = 300
    d1 = jax.random.uniform(k_d1, (n1, 1), jnp.float32,
                            minval=0.05, maxval=r_max * 1.2)
    ref1 = reference_forward(d1, means, betas, weight, bias,
                             r_max=r_max, r_min=r_min)
    out1 = tensornet_core_forward(d1, means, betas, weight, bias,
                                  r_max=r_max, r_min=r_min,
                                  out_dtype=jnp.float32)
    out1 = jax.block_until_ready(out1)
    assert out1.shape == (n1, hidden)
    assert jnp.allclose(out1, ref1, atol=2e-3, rtol=2e-3)

    # Case 2: odd pair count -> pack=1 fallback; small tile -> multi-step grid
    # with a partial tail block; out_dtype=None -> bf16 on v5e, f32 elsewhere.
    n2 = 301
    d2 = jax.random.uniform(k_d2, (n2, 1), jnp.float32,
                            minval=0.05, maxval=r_max * 1.2)
    ref2 = reference_forward(d2, means, betas, weight, bias,
                             r_max=r_max, r_min=r_min)
    out2 = tensornet_core_forward(d2, means, betas, weight, bias,
                                  r_max=r_max, r_min=r_min,
                                  tile_pairs=128, out_dtype=None)
    out2 = jax.block_until_ready(out2)
    assert out2.shape == (n2, hidden)
    assert jnp.allclose(out2.astype(jnp.float32), ref2, atol=3e-2, rtol=3e-2)

    print("KERNEL_OK")
</pallas_src>

<mosaic_0001>
module attributes {stable_mosaic.version = 11 : i64} {
  func.func @kernel(%arg0: i32, %arg1: memref<80x2xf32, #tpu.memory_space<vmem>>, %arg2: memref<1x32xf32, #tpu.memory_space<vmem>>, %arg3: memref<1x32xf32, #tpu.memory_space<vmem>>, %arg4: memref<64x128xbf16, #tpu.memory_space<vmem>>, %arg5: memref<1x128xf32, #tpu.memory_space<vmem>>, %arg6: memref<80x128xf32, #tpu.memory_space<vmem>>) attributes {dimension_semantics = [#tpu.dimension_semantics<parallel>], iteration_bounds = array<i64: 2>, scalar_prefetch = 0 : i64, scratch_operands = 0 : i64, tpu.core_type = #tpu.core_type<tc>, window_params = [{transform_indices = @transform_0, window_bounds = array<i64: 80, 2>}, {pipeline_mode = #tpu.pipeline_mode<synchronous>, transform_indices = @transform_1, window_bounds = array<i64: 1, 32>}, {pipeline_mode = #tpu.pipeline_mode<synchronous>, transform_indices = @transform_2, window_bounds = array<i64: 1, 32>}, {pipeline_mode = #tpu.pipeline_mode<synchronous>, transform_indices = @transform_3, window_bounds = array<i64: 64, 128>}, {pipeline_mode = #tpu.pipeline_mode<synchronous>, transform_indices = @transform_4, window_bounds = array<i64: 1, 128>}, {transform_indices = @transform_5, window_bounds = array<i64: 80, 128>}]} {
    %c0 = arith.constant 0 : index
    %c0_0 = arith.constant 0 : index
    %0 = vector.load %arg1[%c0, %c0_0] : memref<80x2xf32, #tpu.memory_space<vmem>>, vector<80x2xf32>
    %1 = tpu.iota {dimensions = array<i32: 0>} : vector<80x2xi32>
    %c80_i32 = arith.constant 80 : i32
    %2 = arith.muli %arg0, %c80_i32 : i32
    %3 = vector.broadcast %2 : i32 to vector<80x2xi32>
    %4 = arith.addi %1, %3 : vector<80x2xi32>
    %c150_i32 = arith.constant 150 : i32
    %5 = vector.broadcast %c150_i32 : i32 to vector<80x2xi32>
    %6 = arith.cmpi slt, %4, %5 : vector<80x2xi32>
    %cst = arith.constant 1.000000e+01 : f32
    %7 = vector.broadcast %cst : f32 to vector<80x2xf32>
    %8 = arith.select %6, %0, %7 : vector<80x2xi1>, vector<80x2xf32>
    %c0_1 = arith.constant 0 : index
    %c0_2 = arith.constant 0 : index
    %9 = vector.load %arg2[%c0_1, %c0_2] : memref<1x32xf32, #tpu.memory_space<vmem>>, vector<1x32xf32>
    %c0_3 = arith.constant 0 : index
    %c0_4 = arith.constant 0 : index
    %10 = vector.load %arg3[%c0_3, %c0_4] : memref<1x32xf32, #tpu.memory_space<vmem>>, vector<1x32xf32>
    %c0_5 = arith.constant 0 : index
    %c0_6 = arith.constant 0 : index
    %11 = vector.load %arg4[%c0_5, %c0_6] : memref<64x128xbf16, #tpu.memory_space<vmem>>, vector<64x128xbf16>
    %cst_7 = arith.constant 0.000000e+00 : f32
    %12 = vector.broadcast %cst_7 : f32 to vector<80x128xf32>
    %13 = vector.extract_strided_slice %8 {offsets = [0, 0], sizes = [80, 1], strides = [1, 1]} : vector<80x2xf32> to vector<80x1xf32>
    %cst_8 = arith.constant 5.000000e+00 : f32
    %14 = vector.broadcast %cst_8 : f32 to vector<80x1xf32>
    %15 = arith.cmpf olt, %13, %14 : vector<80x1xf32>
    %cst_9 = arith.constant 0.628318548 : f32
    %16 = vector.broadcast %cst_9 : f32 to vector<80x1xf32>
    %17 = arith.mulf %13, %16 : vector<80x1xf32>
    %18 = math.cos %17 : vector<80x1xf32>
    %cst_10 = arith.constant 1.000000e+00 : f32
    %19 = vector.broadcast %cst_10 : f32 to vector<80x1xf32>
    %20 = arith.addf %18, %19 : vector<80x1xf32>
    %cst_11 = arith.constant 5.000000e-01 : f32
    %21 = vector.broadcast %cst_11 : f32 to vector<80x1xf32>
    %22 = arith.mulf %21, %20 : vector<80x1xf32>
    %cst_12 = arith.constant 0.000000e+00 : f32
    %23 = vector.broadcast %cst_12 : f32 to vector<80x1xf32>
    %24 = arith.select %15, %22, %23 : vector<80x1xi1>, vector<80x1xf32>
    %cst_13 = arith.constant 0.000000e+00 : f32
    %25 = vector.broadcast %cst_13 : f32 to vector<80x1xf32>
    %26 = arith.subf %25, %13 : vector<80x1xf32>
    %cst_14 = arith.constant 1.000000e+00 : f32
    %27 = vector.broadcast %cst_14 : f32 to vector<80x1xf32>
    %28 = arith.mulf %27, %26 : vector<80x1xf32>
    %29 = math.exp %28 : vector<80x1xf32>
    %30 = vector.broadcast %29 : vector<80x1xf32> to vector<80x32xf32>
    %31 = vector.broadcast %9 : vector<1x32xf32> to vector<80x32xf32>
    %32 = arith.subf %30, %31 : vector<80x32xf32>
    %cst_15 = arith.constant 0.000000e+00 : f32
    %33 = vector.broadcast %cst_15 : f32 to vector<1x32xf32>
    %34 = arith.subf %33, %10 : vector<1x32xf32>
    %35 = vector.broadcast %34 : vector<1x32xf32> to vector<80x32xf32>
    %36 = arith.mulf %35, %32 : vector<80x32xf32>
    %37 = arith.mulf %36, %32 : vector<80x32xf32>
    %38 = math.exp %37 : vector<80x32xf32>
    %39 = vector.broadcast %24 : vector<80x1xf32> to vector<80x32xf32>
    %40 = arith.mulf %39, %38 : vector<80x32xf32>
    %41 = vector.extract_strided_slice %11 {offsets = [0, 0], sizes = [32, 128], strides = [1, 1]} : vector<64x128xbf16> to vector<32x128xbf16>
    %42 = arith.truncf %40 : vector<80x32xf32> to vector<80x32xbf16>
    %cst_16 = arith.constant dense<0.000000e+00> : vector<80x128xf32>
    %43 = tpu.matmul %42, %41, %cst_16 {dimension_numbers = #tpu.dot_dimension_numbers<[1], [0], [0], [1], [0, 0, 1, 1], [], []>} : vector<80x32xbf16>, vector<32x128xbf16>, vector<80x128xf32> -> vector<80x128xf32>
    %44 = arith.addf %12, %43 : vector<80x128xf32>
    %45 = vector.extract_strided_slice %8 {offsets = [0, 1], sizes = [80, 1], strides = [1, 1]} : vector<80x2xf32> to vector<80x1xf32>
    %cst_17 = arith.constant 5.000000e+00 : f32
    %46 = vector.broadcast %cst_17 : f32 to vector<80x1xf32>
    %47 = arith.cmpf olt, %45, %46 : vector<80x1xf32>
    %cst_18 = arith.constant 0.628318548 : f32
    %48 = vector.broadcast %cst_18 : f32 to vector<80x1xf32>
    %49 = arith.mulf %45, %48 : vector<80x1xf32>
    %50 = math.cos %49 : vector<80x1xf32>
    %cst_19 = arith.constant 1.000000e+00 : f32
    %51 = vector.broadcast %cst_19 : f32 to vector<80x1xf32>
    %52 = arith.addf %50, %51 : vector<80x1xf32>
    %cst_20 = arith.constant 5.000000e-01 : f32
    %53 = vector.broadcast %cst_20 : f32 to vector<80x1xf32>
    %54 = arith.mulf %53, %52 : vector<80x1xf32>
    %cst_21 = arith.constant 0.000000e+00 : f32
    %55 = vector.broadcast %cst_21 : f32 to vector<80x1xf32>
    %56 = arith.select %47, %54, %55 : vector<80x1xi1>, vector<80x1xf32>
    %cst_22 = arith.constant 0.000000e+00 : f32
    %57 = vector.broadcast %cst_22 : f32 to vector<80x1xf32>
    %58 = arith.subf %57, %45 : vector<80x1xf32>
    %cst_23 = arith.constant 1.000000e+00 : f32
    %59 = vector.broadcast %cst_23 : f32 to vector<80x1xf32>
    %60 = arith.mulf %59, %58 : vector<80x1xf32>
    %61 = math.exp %60 : vector<80x1xf32>
    %62 = vector.broadcast %61 : vector<80x1xf32> to vector<80x32xf32>
    %63 = vector.broadcast %9 : vector<1x32xf32> to vector<80x32xf32>
    %64 = arith.subf %62, %63 : vector<80x32xf32>
    %cst_24 = arith.constant 0.000000e+00 : f32
    %65 = vector.broadcast %cst_24 : f32 to vector<1x32xf32>
    %66 = arith.subf %65, %10 : vector<1x32xf32>
    %67 = vector.broadcast %66 : vector<1x32xf32> to vector<80x32xf32>
    %68 = arith.mulf %67, %64 : vector<80x32xf32>
    %69 = arith.mulf %68, %64 : vector<80x32xf32>
    %70 = math.exp %69 : vector<80x32xf32>
    %71 = vector.broadcast %56 : vector<80x1xf32> to vector<80x32xf32>
    %72 = arith.mulf %71, %70 : vector<80x32xf32>
    %73 = vector.extract_strided_slice %11 {offsets = [32, 0], sizes = [32, 128], strides = [1, 1]} : vector<64x128xbf16> to vector<32x128xbf16>
    %74 = arith.truncf %72 : vector<80x32xf32> to vector<80x32xbf16>
    %cst_25 = arith.constant dense<0.000000e+00> : vector<80x128xf32>
    %75 = tpu.matmul %74, %73, %cst_25 {dimension_numbers = #tpu.dot_dimension_numbers<[1], [0], [0], [1], [0, 0, 1, 1], [], []>} : vector<80x32xbf16>, vector<32x128xbf16>, vector<80x128xf32> -> vector<80x128xf32>
    %76 = arith.addf %44, %75 : vector<80x128xf32>
    %c0_26 = arith.constant 0 : index
    %c0_27 = arith.constant 0 : index
    %77 = vector.load %arg5[%c0_26, %c0_27] : memref<1x128xf32, #tpu.memory_space<vmem>>, vector<1x128xf32>
    %78 = vector.broadcast %77 : vector<1x128xf32> to vector<80x128xf32>
    %79 = arith.addf %76, %78 : vector<80x128xf32>
    %c0_28 = arith.constant 0 : index
    %c0_29 = arith.constant 0 : index
    %80 = vector.load %arg6[%c0_28, %c0_29] : memref<80x128xf32, #tpu.memory_space<vmem>>, vector<80x128xf32>
    tpu.vector_store %arg6[%c0_28, %c0_29], %79 {strides = array<i32>} : memref<80x128xf32, #tpu.memory_space<vmem>>, vector<80x128xf32>,
    return
  }
  func.func @transform_0(%arg0: i32) -> (i32, i32) {
    %c0_i32 = arith.constant 0 : i32
    %c0_i32_0 = arith.constant 0 : i32
    return %arg0, %c0_i32 : i32, i32
  }
  func.func @transform_1(%arg0: i32) -> (i32, i32) {
    %c0_i32 = arith.constant 0 : i32
    %c0_i32_0 = arith.constant 0 : i32
    %c0_i32_1 = arith.constant 0 : i32
    return %c0_i32, %c0_i32_0 : i32, i32
  }
  func.func @transform_2(%arg0: i32) -> (i32, i32) {
    %c0_i32 = arith.constant 0 : i32
    %c0_i32_0 = arith.constant 0 : i32
    %c0_i32_1 = arith.constant 0 : i32
    return %c0_i32, %c0_i32_0 : i32, i32
  }
  func.func @transform_3(%arg0: i32) -> (i32, i32) {
    %c0_i32 = arith.constant 0 : i32
    %c0_i32_0 = arith.constant 0 : i32
    %c0_i32_1 = arith.constant 0 : i32
    return %c0_i32, %c0_i32_0 : i32, i32
  }
  func.func @transform_4(%arg0: i32) -> (i32, i32) {
    %c0_i32 = arith.constant 0 : i32
    %c0_i32_0 = arith.constant 0 : i32
    %c0_i32_1 = arith.constant 0 : i32
    return %c0_i32, %c0_i32_0 : i32, i32
  }
  func.func @transform_5(%arg0: i32) -> (i32, i32) {
    %c0_i32 = arith.constant 0 : i32
    %c0_i32_0 = arith.constant 0 : i32
    return %arg0, %c0_i32 : i32, i32
  }
}

</mosaic_0001>

<bundles_post_ra>
// kernel: tpu_custom_call.1
= control target key start
LH: loop header
LB: loop body
LE: loop exit
PB: predicated region body
PF: predicated region fallthrough
CT: control target
= control target key end

     0   :  { %10 = vsyncpa [#allocation3], 0  ;;  %s3889_s0 = inlined_call_operand.vmem [shape: f32[150,2], index: 0, kind: input, shape index: {}]   ;;  %s3890_s1 = inlined_call_operand.vmem [shape: f32[1,32], index: 1, kind: input, shape index: {}]   ;;  %s3891_s2 = inlined_call_operand.vmem [shape: f32[1,32], index: 2, kind: input, shape index: {}]   ;;  %s3892_s3 = inlined_call_operand.vmem [shape: bf16[64,128], index: 3, kind: input, shape index: {}]   ;;  %s3893_s4 = inlined_call_operand.vmem [shape: f32[1,128], index: 4, kind: input, shape index: {}]   ;;  %s3894_s5 = inlined_call_operand.hbm [shape: f32[150,128], index: 5, kind: output, shape index: {}]  }
   0x1   :  { %12 = vsyncpa [#allocation3 + $0x1], 0  ;;  %s2517_s18 = smov 0   ;;  %s2519_s19 = smov 0  }
   0x2   :  { %s2521_s20 = smov 0   ;;  %s2523_s21 = smov 0  }
   0x3 LB: > { %s2538_s22 = sadd.s32 4294967295, %s2472_s21   ;;  %s2057_s23 = sadd.s32 4294967294, %s2472_s21   ;;  %s2472_s21 = sphi %s2523_s21, %s3920_s21   ;;  %s2468_s20 = sphi %s2521_s20, %s3919_s20   ;;  %s2464_s19 = sphi %s2519_s19, %s3918_s19   ;;  %s2460_s18 = sphi %s2517_s18, %s3917_s18  }
   0x4   : > { %s2542_s24 = sadd.s32 1, %s2472_s21   ;;  %s135_s25 = sadd.s32 1, %s2468_s20 }
   0x5   : > { %s132_s26 = ssub.s32 %s2472_s21, %s2542_s24  ;;  %p145_p0 = scmp.ne.s32.totalorder %s2468_s20, %s2464_s19 }
   0x6   : > { %p133_p1 = scmp.eq.s32.totalorder %s132_s26, 0  ;;  %p146_p2 = scmp.eq.s32.totalorder %s2538_s22, 1 }
   0x7   : > { %p151_p3 = scmp.ne.s32.totalorder %s2464_s19, %s2460_s18  ;;  %p152_p4 = scmp.eq.s32.totalorder %s2057_s23, 1 }
   0x8   : > { %s2553_s27 = scalar_select %p133_p1, %s2468_s20, %s135_s25  }
   0x9   : > { %p2555_p5 = por %p146_p2, %p145_p0  ;;  %p2559_p6 = por %p152_p4, %p151_p3 }
   0xa   : > { %p2060_p7 = scmp.ge.s32.totalorder %s2472_s21, 1  ;;  %p199_p8 = scmp.lt.s32.totalorder %s2472_s21, 3 }
   0xc   : > { %p200_p9 = pnand %p2060_p7, %p199_p8 }
   0xd   : > { %s2566_s30 = smul.u32 (!%p200_p9), 10, %s2538_s22  ;;  %s228_s9 = sand.u32 (!%p200_p9), 1, %s2464_s19  }
   0xe   : > { %203 = sbr.rel (%p200_p9) target bundleno = 700 (0x2bc), region = 40  ;;  %s3829_s14 = scalar_lea.sflag (!%p200_p9), [#allocation3], %s228_s9 }
   0xf   : > { %s272_s6 = smul.u32 (!%p200_p9), 80, %s2538_s22  ;;  %p236_p10 = scmp.lt.s32.totalorder (!%p200_p9), %s2566_s30, 18 }
  0x10   : > { %s2188_s10 = smul.u32 (!%p200_p9), 80, %s228_s9 }
  0x12   : > { %s3806_s13 = scalar_lea.vmem (!%p200_p9), [#allocation2], %s2188_s10 }
  0x13   : > { %v261_v0 = vlaneseq  ;;  %v2474_v1 = vmov 1   ;;  %v2475_v2 = vmov 0   ;;  %v273_v4 = vstv %s272_s6  ;;  %s237_s7 = scalar_select %p236_p10, %s2566_s30, 18 }
  0x14   : > { %2280 = vset.pattern.permute.xlu1 %v2474_v1  ;;  %2279 = vset.pattern.permute.xlu0 %v2475_v2  ;;  %s1984_s15 = ssub.s32 (%p2555_p5), 19, %s2566_s30 }
  0x15   : > { %v2572_v3 = vshrl.u32 %v261_v0, 7  ;;  %s2061_s8 = sshll.u32 %s237_s7, 3  ;;  %p1985_p11 = scmp.lt.s32.totalorder (%p2555_p5), %s1984_s15, 10 }
  0x16   : > { %s2584_s11 = scalar_lea.vmem %s3889_s0, %s2061_s8 }
  0x17   : > { %v274_v5 = vadd.s32 %v273_v4, %v2572_v3  ;;  %v263_v6 = vadd.s32 8, %v2572_v3  ;;  %v265_v7 = vadd.s32 24, %v2572_v3  ;;  %v266_v8 = vadd.s32 32, %v2572_v3  ;;  %v251_v13 = vld [vmem:[%s2584_s11] sm:$0xff]  ;;  %v252_v14 = vld [vmem:[%s2584_s11 + $0x8] sm:$0xff]  ;;  %v254_v18 = vld [vmem:[%s2584_s11 + $0x18] sm:$0xff] }
  0x18   : > { %v267_v9 = vadd.s32 40, %v2572_v3  ;;  %v268_v10 = vadd.s32 48, %v2572_v3  ;;  %v264_v15 = vadd.s32 16, %v2572_v3  ;;  %v269_v19 = vadd.s32 56, %v2572_v3  ;;  %v253_v31 = vld [vmem:[%s2584_s11 + $0x10] sm:$0xff]  ;;  %v255_v32 = vld [vmem:[%s2584_s11 + $0x20] sm:$0xff] }
  0x19   : > { %vm284_vm0 = vcmp.lt.s32.totalorder %v274_v5, 150  ;;  %v275_v11 = vadd.s32 %v273_v4, %v263_v6  ;;  %v277_v12 = vadd.s32 %v273_v4, %v265_v7  ;;  %v278_v22 = vadd.s32 %v273_v4, %v266_v8  ;;  %v256_v34 = vld [vmem:[%s2584_s11 + $0x28] sm:$0xff]  ;;  %v257_v37 = vld [vmem:[%s2584_s11 + $0x30] sm:$0xff]  ;;  %v258_v38 = vld [vmem:[%s2584_s11 + $0x38] sm:$0xff] }
  0x1a   : > { %v2589_v16 = vsel %vm284_vm0, %v251_v13, 10.0  ;;  %v279_v23 = vadd.s32 %v273_v4, %v267_v9  ;;  %v280_v24 = vadd.s32 %v273_v4, %v268_v10  ;;  %v276_v28 = vadd.s32 %v273_v4, %v264_v15  ;;  %v260_v51 = vld [vmem:[%s2584_s11 + $0x48] sm:$0xff]  ;;  %v259_v58 = vld [vmem:[%s2584_s11 + $0x40] sm:$0xff] }
  0x1b   : > { %vm285_vm1 = vcmp.lt.s32.totalorder %v275_v11, 150  ;;  %vm287_vm2 = vcmp.lt.s32.totalorder %v277_v12, 150  ;;  %v1394_v20 = vsub.f32 0.0, %v2589_v16  ;;  %v281_v30 = vadd.s32 %v273_v4, %v269_v19 }
  0x1c   : > { %v2591_v17 = vsel %vm285_vm1, %v252_v14, 10.0  ;;  %v2597_v27 = vsel %vm287_vm2, %v254_v18, 10.0  ;;  %vm288_vm3 = vcmp.lt.s32.totalorder %v278_v22, 150  ;;  %vm286_vm4 = vcmp.lt.s32.totalorder %v276_v28, 150 }
  0x1d   : > { %v1395_v21 = vsub.f32 0.0, %v2591_v17  ;;  %v1404_v25 = vmul.f32 1.442695, %v1394_v20  ;;  %v1397_v29 = vsub.f32 0.0, %v2597_v27  ;;  %v271_v33 = vadd.s32 72, %v2572_v3 }
  0x1e   : > { %vm289_vm5 = vcmp.lt.s32.totalorder %v279_v23, 150  ;;  %vm290_vm6 = vcmp.lt.s32.totalorder %v280_v24, 150  ;;  %v270_v35 = vadd.s32 64, %v2572_v3  ;;  %vm291_vm7 = vcmp.lt.s32.totalorder %v281_v30, 150 }
  0x1f   : > { %v1406_v26 = vmul.f32 1.442695, %v1395_v21  ;;  %2312 = vpow2.f32 %v1404_v25  ;;  %v1410_v36 = vmul.f32 1.442695, %v1397_v29  ;;  %v2607_v39 = vsel %vm286_vm4, %v253_v31, 10.0 }
  0x20   : > { %v283_v40 = vadd.s32 %v273_v4, %v271_v33  ;;  %v2609_v41 = vsel %vm288_vm3, %v255_v32, 10.0  ;;  %v1396_v42 = vsub.f32 0.0, %v2607_v39  ;;  %v2613_v43 = vmul.f32 0.62831855, %v2591_v17 }
  0x21   : > { %2314 = vpow2.f32 %v1406_v26  ;;  %v1398_v44 = vsub.f32 0.0, %v2609_v41  ;;  %v2616_v45 = vsel %vm289_vm5, %v256_v34, 10.0  ;;  %v2618_v46 = vsel %vm290_vm6, %v257_v37, 10.0 }
  0x22   : > { %v2620_v47 = vsel %vm291_vm7, %v258_v38, 10.0  ;;  %v1408_v48 = vmul.f32 1.442695, %v1396_v42  ;;  %v282_v49 = vadd.s32 %v273_v4, %v270_v35  ;;  %2316 = vpow2.f32 %v1410_v36 }
  0x23   : > { %v1399_v50 = vsub.f32 0.0, %v2616_v45  ;;  %vm293_vm8 = vcmp.lt.s32.totalorder %v283_v40, 150  ;;  %v437_v52 = vand.u32 2147483647, %v2613_v43  ;;  %v1400_v53 = vsub.f32 0.0, %v2618_v46 }
  0x24   : > { %2318 = vpow2.f32 %v1408_v48  ;;  %v440_v54 = vand.u32 2139095040, %v2613_v43  ;;  %v2628_v55 = vmul.f32 0.62831855, %v2589_v16  ;;  %v1412_v56 = vmul.f32 1.442695, %v1398_v44 }
  0x25   : > { %v1401_v57 = vsub.f32 0.0, %v2620_v47  ;;  %vm292_vm9 = vcmp.lt.s32.totalorder %v282_v49, 150  ;;  %v2632_v59 = vsel %vm293_vm8, %v260_v51, 10.0  ;;  %v444_v63 = vand.u32 8388607, %v437_v52 }
  0x26   : > { %v441_v60 = vshrl.u32 %v440_v54, 23  ;;  %v334_v61 = vand.u32 2147483647, %v2628_v55  ;;  %v1403_v62 = vsub.f32 0.0, %v2632_v59  ;;  %v337_v0 = vand.u32 2139095040, %v2628_v55 }
  0x27   : > { %v1414_v4 = vmul.f32 1.442695, %v1399_v50  ;;  %v1416_v5 = vmul.f32 1.442695, %v1400_v53  ;;  %v2639_v8 = vsel %vm292_vm9, %v259_v58, 10.0  ;;  %2320 = vpow2.f32 %v1412_v56 }
  0x28   : > { %v2066_v6 = vadd.s32 4294967169, %v441_v60  ;;  %v338_v9 = vshrl.u32 %v337_v0, 23  ;;  %v341_v10 = vand.u32 8388607, %v334_v61  ;;  %v2644_v11 = vmul.f32 0.62831855, %v2597_v27 }
  0x29   : > { %v1418_v12 = vmul.f32 1.442695, %v1401_v57  ;;  %v1402_v13 = vsub.f32 0.0, %v2639_v8  ;;  %v1422_v18 = vmul.f32 1.442695, %v1403_v62  ;;  %v445_v19 = vor.u32 8388608, %v444_v63 }
  0x2a   : > { %v447_v14 = vadd.s32 1, %v2066_v6  ;;  %v2062_v20 = vadd.s32 4294967169, %v338_v9  ;;  %v342_v21 = vor.u32 8388608, %v341_v10  ;;  %2322 = vpow2.f32 %v1414_v4 }
  0x2b   : > { %v646_v22 = vand.u32 2139095040, %v2644_v11  ;;  %2324 = vpow2.f32 %v1416_v5  ;;  %v2650_v28 = vmul.f32 1.442695, %v1402_v13  ;;  %v2652_v29 = vshll.u32 %v445_v19, 8 }
  0x2c   : > { %v2313_v7 = vpop.eup %2312  ;;  %vm448_vm10 = vcmp.gt.s32.totalorder %v447_v14, 0  ;;  %v344_v24 = vadd.s32 1, %v2062_v20  ;;  %2326 = vpow2.f32 %v1418_v12  ;;  %v2654_v30 = vshll.u32 %v342_v21, 8 }
  0x2d   : > { %1603 = vperm.xlu1 %2280, %v2313_v7   ;;  %1426 = vperm.xlu0 %2279, %v2313_v7   ;;  %v449_v23 = vsel %vm448_vm10, %v447_v14, 0  ;;  %2328 = vpow2.f32 %v1422_v18  ;;  %v2476_v33 = vmov 683565275   ;;  %v2477_v35 = vmov 2475754826  }
  0x2e   : > { %v2315_v15 = vpop.eup %2314  ;;  %v2648_v25 = vshrl.u32 %v449_v23, 5  ;;  %v451_v26 = vand.u32 31, %v449_v23  ;;  %v2658_v37 = vshrl.u32 %v646_v22, 23  ;;  %v2478_v40 = vmov 2131351028  }
  0x2f   : > { %v2317_v31 = vpop.eup %2316  ;;  %v2479_v44 = vmov 2102212464   ;;  %v2480_v49 = vmov 920167782   ;;  %vm345_vm11 = vcmp.gt.s32.totalorder %v344_v24, 0  ;;  %2330 = vpow2.f32 %v2650_v28 }
  0x30   : > { %v452_v32 = vsub.s32 32, %v451_v26  ;;  %v454_v34 = vshll.u32 %v2476_v33, %v451_v26  ;;  %v457_v36 = vshll.u32 %v2477_v35, %v451_v26  ;;  %v460_v42 = vshll.u32 %v2478_v40, %v451_v26 }
  0x31   : > { %1607 = vperm.xlu1 %2280, %v2315_v15   ;;  %1431 = vperm.xlu0 %2279, %v2315_v15   ;;  %v2319_v38 = vpop.eup %2318  ;;  %v463_v48 = vshll.u32 %v2479_v44, %v451_v26  ;;  %v466_v50 = vshll.u32 %v2480_v49, %v451_v26  ;;  %vm469_vm12 = vcmp.lt.s32.totalorder %v2648_v25, 1  ;;  %v2481_v58 = vmov 1326507024  }
  0x32   : > { %v453_v51 = vshrl.u32 %v2476_v33, %v452_v32  ;;  %v455_v53 = vshrl.u32 %v2477_v35, %v452_v32  ;;  %v458_v54 = vshrl.u32 %v2478_v40, %v452_v32  ;;  %v461_v56 = vshrl.u32 %v2479_v44, %v452_v32 }
  0x33   : > { %v464_v57 = vshrl.u32 %v2480_v49, %v452_v32  ;;  %v467_v60 = vshrl.u32 %v2481_v58, %v452_v32  ;;  %vm470_vm13 = vcmp.lt.s32.totalorder %v2648_v25, 2  ;;  %vm472_vm14 = vcmp.lt.s32.totalorder %v2648_v25, 4 }
  0x34   : > { %v456_v62 = vor.u32 %v455_v53, %v454_v34  ;;  %v459_v63 = vor.u32 %v458_v54, %v457_v36  ;;  %v346_v0 = vsel %vm345_vm11, %v344_v24, 0  ;;  %v462_v4 = vor.u32 %v461_v56, %v460_v42  ;;  %v2321_v13 = vpop.eup %2320 }
  0x35   : > { %2281 = vset.pattern.permute.xlu1 %v2475_v2  ;;  %1436 = vperm.xlu0 %2279, %v2319_v38   ;;  %v465_v5 = vor.u32 %v464_v57, %v463_v48  ;;  %v468_v6 = vor.u32 %v467_v60, %v466_v50  ;;  %vm471_vm15 = vcmp.lt.s32.totalorder %v2648_v25, 3  ;;  %v2680_v10 = vshrl.u32 %v346_v0, 5 }
  0x36   : > { %1441 = vperm.xlu1 %2281, %v2317_v31   ;;  %v473_v7 = vsel %vm469_vm12, %v453_v51, %v456_v62  ;;  %v477_v9 = vsel %vm469_vm12, %v456_v62, %v459_v63  ;;  %v348_v12 = vand.u32 31, %v346_v0  ;;  %v474_v14 = vsel %vm472_vm14, %v462_v4, 2102212464 }
  0x37   : > { %v478_v15 = vsel %vm472_vm14, %v465_v5, 920167782  ;;  %v481_v18 = vsel %vm469_vm12, %v459_v63, %v462_v4  ;;  %v482_v19 = vsel %vm472_vm14, %v468_v6, 1326507024  ;;  %v475_v20 = vsel %vm471_vm15, %v459_v63, %v474_v14  ;;  %v2697_v24 = vpop.eup %2322 }
  0x38   : > { %v479_v21 = vsel %vm471_vm15, %v462_v4, %v478_v15  ;;  %v483_v22 = vsel %vm471_vm15, %v465_v5, %v482_v19  ;;  %v349_v23 = vsub.s32 32, %v348_v12  ;;  %v476_v26 = vsel %vm470_vm13, %v473_v7, %v475_v20  ;;  %v2706_v36 = vpop.eup %2324 }
  0x39   : > { %2282 = vset.pattern.permute.xlu0 %v2474_v1  ;;  %v480_v32 = vsel %vm470_vm13, %v477_v9, %v479_v21  ;;  %v351_v34 = vshll.u32 %v2476_v33, %v348_v12  ;;  %v2717_v51 = vpop.eup %2326  ;;  %v492_v25 = vmul.u32 %v2652_v29, %v476_v26  ;;  %v354_v56 = vshll.u32 %v2477_v35, %v348_v12 }
  0x3a   : > { %2283 = vset.pattern.permute.xlu1 %v2474_v1  ;;  %1611 = vperm.xlu0 %2282, %v2319_v38   ;;  %v2713_v48 = vmul.u32.u64.low %v2652_v29, %v480_v32  ;;  %v2714_v50 = vmul.u32.u64.high %v2652_v29, %v480_v32, %v2713_v48  ;;  %v350_v53 = vshrl.u32 %v2476_v33, %v349_v23  ;;  %v352_v54 = vshrl.u32 %v2477_v35, %v349_v23  ;;  %v2724_v57 = vpop.eup %2328 }
  0x3b   : > { %1615 = vperm.xlu1 %2283, %v2317_v31   ;;  %v484_v31 = vsel %vm470_vm13, %v481_v18, %v483_v22  ;;  %v355_v60 = vshrl.u32 %v2478_v40, %v349_v23  ;;  %v357_v62 = vshll.u32 %v2478_v40, %v348_v12  ;;  %v358_v63 = vshrl.u32 %v2479_v44, %v349_v23 }
  0x3c   : > { %v2709_v38 = vmul.u32.u64.low %v2652_v29, %v484_v31  ;;  %v2710_v42 = vmul.u32.u64.high %v2652_v29, %v484_v31, %v2709_v38  ;;  %v2074_v29 = vadd.s32 4294967169, %v2658_v37  ;;  %v353_v0 = vor.u32 %v352_v54, %v351_v34 }
  0x3d   : > { %v360_v4 = vshll.u32 %v2479_v44, %v348_v12  ;;  %v361_v5 = vshrl.u32 %v2480_v49, %v349_v23  ;;  %v363_v6 = vshll.u32 %v2480_v49, %v348_v12  ;;  %v495_v7 = vadd.s32 1, %v2714_v50 }
  0x3e   : > { %2285 = vset.pattern.permute.xlu0 %v2475_v2  ;;  %vm494_vm0 = vc.u32 %v2710_v42, %v2713_v48  ;;  %v356_v9 = vor.u32 %v355_v60, %v354_v56  ;;  %vm366_vm1 = vcmp.lt.s32.totalorder %v2680_v10, 1  ;;  %v359_v14 = vor.u32 %v358_v63, %v357_v62 }
  0x3f   : > { %2284 = vset.pattern.permute.xlu1 %v2475_v2  ;;  %1451 = vperm.xlu0 %2285, %v2697_v24   ;;  %v362_v15 = vor.u32 %v361_v5, %v360_v4  ;;  %v364_v37 = vshrl.u32 %v2481_v58, %v349_v23  ;;  %vm367_vm2 = vcmp.lt.s32.totalorder %v2680_v10, 2  ;;  %v496_v18 = vsel %vm494_vm0, %v495_v7, %v2714_v50 }
  0x40   : > { %1446 = vperm.xlu1 %2284, %v2321_v13   ;;  %vm368_vm3 = vcmp.lt.s32.totalorder %v2680_v10, 3  ;;  %vm369_vm4 = vcmp.lt.s32.totalorder %v2680_v10, 4  ;;  %v370_v12 = vsel %vm366_vm1, %v350_v53, %v353_v0  ;;  %v497_v19 = vadd.s32 %v496_v18, %v492_v25 }
  0x41   : > { %v365_v20 = vor.u32 %v364_v37, %v363_v6  ;;  %v371_v21 = vsel %vm369_vm4, %v359_v14, 2102212464  ;;  %v374_v22 = vsel %vm366_vm1, %v353_v0, %v356_v9  ;;  %v375_v26 = vsel %vm369_vm4, %v362_v15, 920167782 }
  0x42   : > { %v372_v23 = vsel %vm368_vm3, %v356_v9, %v371_v21  ;;  %v378_v32 = vsel %vm366_vm1, %v356_v9, %v359_v14  ;;  %v653_v31 = vadd.s32 1, %v2074_v29  ;;  %v498_v34 = vadd.s32 536870912, %v497_v19 }
  0x43   : > { %1461 = vperm.xlu0 %2285, %v2717_v51   ;;  %v376_v38 = vsel %vm368_vm3, %v359_v14, %v375_v26  ;;  %v379_v50 = vsel %vm369_vm4, %v365_v20, 1326507024  ;;  %v643_v25 = vand.u32 2147483647, %v2644_v11  ;;  %vm439_vm7 = vcmp.lt.s32.totalorder %v2613_v43, 0 }
  0x44   : > { %2286 = vset.pattern.permute.xlu1 %v2474_v1  ;;  %v377_v53 = vsel %vm367_vm2, %v374_v22, %v376_v38  ;;  %v380_v54 = vsel %vm368_vm3, %v362_v15, %v379_v50  ;;  %vm654_vm5 = vcmp.gt.s32.totalorder %v653_v31, 0  ;;  %v2764_v56 = vshrl.u32 %v498_v34, 30 }
  0x45   : > { %1619 = vperm.xlu1 %2286, %v2321_v13   ;;  %v373_v13 = vsel %vm367_vm2, %v370_v12, %v372_v23  ;;  %v381_v60 = vsel %vm367_vm2, %v378_v32, %v380_v54  ;;  %v2769_v62 = vmul.u32.u64.low %v2654_v30, %v377_v53  ;;  %v2770_v63 = vmul.u32.u64.high %v2654_v30, %v377_v53, %v2769_v62 }
  0x46   : > { %v2775_v29 = vmul.u32.u64.low %v2654_v30, %v381_v60  ;;  %v2776_v0 = vmul.u32.u64.high %v2654_v30, %v381_v60, %v2775_v29  ;;  %v655_v4 = vsel %vm654_vm5, %v653_v31, 0  ;;  %v500_v5 = vshll.u32 %v2764_v56, 30 }
  0x47   : > { %1471 = vperm.xlu0 %2285, %v2724_v57   ;;  %v657_v6 = vand.u32 31, %v655_v4  ;;  %v389_v7 = vmul.u32 %v2654_v30, %v373_v13  ;;  %v650_v10 = vand.u32 8388607, %v643_v25  ;;  %v392_v14 = vadd.s32 1, %v2770_v63 }
  0x48   : > { %v2783_v9 = vsub.s32 %v497_v19, %v500_v5  ;;  %vm391_vm6 = vc.u32 %v2776_v0, %v2769_v62  ;;  %v2790_v15 = vmul.f32 0.62831855, %v2607_v39  ;;  %v2800_v26 = vshrl.u32 %v655_v4, 5 }
  0x49   : > { %1623 = vperm.xlu1 %2286, %v2697_v24   ;;  %v658_v24 = vsub.s32 32, %v657_v6  ;;  %v393_v37 = vsel %vm391_vm6, %v392_v14, %v2770_v63  ;;  %v651_v18 = vor.u32 8388608, %v650_v10  ;;  %v660_v12 = vshll.u32 %v2476_v33, %v657_v6 }
  0x4a   : > { %v503_v30 = vsub.s32 0, %v2783_v9  ;;  %v394_v28 = vadd.s32 %v393_v37, %v389_v7  ;;  %v663_v21 = vshll.u32 %v2477_v35, %v657_v6  ;;  %v666_v32 = vshll.u32 %v2478_v40, %v657_v6 }
  0x4b   : > { %v661_v20 = vshrl.u32 %v2477_v35, %v658_v24  ;;  %v664_v22 = vshrl.u32 %v2478_v40, %v658_v24  ;;  %v543_v31 = vand.u32 2139095040, %v2790_v15  ;;  %v667_v38 = vshrl.u32 %v2479_v44, %v658_v24 }
  0x4c   : > { %v2067_v19 = vmin.u32 %v503_v30, %v2783_v9  ;;  %v395_v23 = vadd.s32 536870912, %v394_v28  ;;  %v669_v50 = vshll.u32 %v2479_v44, %v657_v6  ;;  %v670_v13 = vshrl.u32 %v2480_v49, %v658_v24 }
  0x4d   : > { %2287 = vset.pattern.permute.xlu1 %v2475_v2  ;;  %v493_v53 = vadd.s32 %v2713_v48, %v2710_v42  ;;  %v523_v54 = vsub.s32 4, %v2764_v56  ;;  %v2815_v63 = vshll.u32 %v651_v18, 8  ;;  %v659_v4 = vshrl.u32 %v2476_v33, %v658_v24 }
  0x4e   : > { %1456 = vperm.xlu1 %2287, %v2706_v36   ;;  %v505_v34 = vclz %v2067_v19  ;;  %v2813_v60 = vshrl.u32 %v395_v23, 30  ;;  %v662_v5 = vor.u32 %v661_v20, %v660_v12  ;;  %v665_v7 = vor.u32 %v664_v22, %v663_v21  ;;  %v2331_v19 = vpop.eup %2330 }
  0x4f   : > { %v671_v14 = vor.u32 %v670_v13, %v669_v50  ;;  %v672_v30 = vshll.u32 %v2480_v49, %v657_v6  ;;  %v668_v42 = vor.u32 %v667_v38, %v666_v32  ;;  %vm675_vm9 = vcmp.lt.s32.totalorder %v2800_v26, 1 }
  0x50   : > { %v2068_v29 = vadd.s32 4294967294, %v505_v34  ;;  %v397_v10 = vshll.u32 %v2813_v60, 30  ;;  %vm678_vm10 = vcmp.lt.s32.totalorder %v2800_v26, 4  ;;  %vm2826_vm11 = vcmp.le.f32.partialorder %v437_v52, 0.7853982 }
  0x51   : > { %vm676_vm12 = vcmp.lt.s32.totalorder %v2800_v26, 2  ;;  %vm677_vm13 = vcmp.lt.s32.totalorder %v2800_v26, 3  ;;  %v683_v21 = vsel %vm675_vm9, %v662_v5, %v665_v7  ;;  %v524_v34 = vsel %vm439_vm7, %v523_v54, %v2764_v56 }
  0x52   : > { %2288 = vset.pattern.permute.xlu1 %v2474_v1  ;;  %vm2069_vm8 = vcmp.lt.s32.totalorder %v2068_v29, 0  ;;  %v2830_v18 = vsub.s32 %v394_v28, %v397_v10  ;;  %v684_v28 = vsel %vm678_vm10, %v671_v14, 920167782  ;;  %v679_v50 = vsel %vm675_vm9, %v659_v4, %v662_v5 }
  0x53   : > { %1627 = vperm.xlu1 %2288, %v2706_v36   ;;  %v673_v36 = vshrl.u32 %v2481_v58, %v658_v24  ;;  %v508_v37 = vsel %vm2069_vm8, 0, %v2068_v29  ;;  %v685_v32 = vsel %vm677_vm13, %v668_v42, %v684_v28  ;;  %v687_v10 = vsel %vm675_vm9, %v665_v7, %v668_v42 }
  0x54   : > { %v509_v6 = vsub.s32 32, %v508_v37  ;;  %v510_v24 = vshll.u32 %v2783_v9, %v508_v37  ;;  %v513_v12 = vsub.s32 4294967266, %v508_v37  ;;  %v400_v52 = vsub.s32 0, %v2830_v18 }
  0x55   : > { %v674_v20 = vor.u32 %v673_v36, %v672_v30  ;;  %v544_v9 = vshrl.u32 %v543_v31, 23  ;;  %v686_v31 = vsel %vm676_vm12, %v683_v21, %v685_v32  ;;  %vm336_vm14 = vcmp.lt.s32.totalorder %v2628_v55, 0 }
  0x56   : > { %v511_v22 = vshrl.u32 %v493_v53, %v509_v6  ;;  %v514_v23 = vadd.s32 127, %v513_v12  ;;  %v2063_v38 = vmin.u32 %v400_v52, %v2830_v18  ;;  %v540_v6 = vand.u32 2147483647, %v2790_v15 }
  0x57   : > { %1631 = vperm.xlu1 %2288, %v2717_v51   ;;  %v680_v51 = vsel %vm678_vm10, %v668_v42, 2102212464  ;;  %v688_v56 = vsel %vm678_vm10, %v674_v20, 1326507024  ;;  %v2860_v54 = vmul.u32.u64.low %v2815_v63, %v686_v31  ;;  %v2861_v36 = vmul.u32.u64.high %v2815_v63, %v686_v31, %v2860_v54 }
  0x58   : > { %v681_v13 = vsel %vm677_vm13, %v665_v7, %v680_v51  ;;  %v512_v53 = vor.u32 %v511_v22, %v510_v24  ;;  %v515_v29 = vshll.u32 %v514_v23, 23  ;;  %v402_v30 = vclz %v2063_v38 }
  0x59   : > { %v689_v37 = vsel %vm677_vm13, %v671_v14, %v688_v56  ;;  %v682_v7 = vsel %vm676_vm12, %v679_v50, %v681_v13  ;;  %v2070_v12 = vadd.s32 4294967169, %v544_v9  ;;  %v526_v52 = vsel %vm2826_vm11, 0, %v524_v34 }
  0x5a   : > { %v516_v4 = vor.u32 4788187, %v515_v29  ;;  %v519_v5 = vcvt.s32.f32 %v512_v53  ;;  %v2064_v24 = vadd.s32 4294967294, %v402_v30  ;;  %v690_v42 = vsel %vm676_vm12, %v687_v10, %v689_v37 }
  0x5b   : > { %2289 = vset.pattern.permute.xlu1 %v2475_v2  ;;  %v2876_v20 = vmul.u32.u64.low %v2815_v63, %v690_v42  ;;  %v2877_v21 = vmul.u32.u64.high %v2815_v63, %v690_v42, %v2876_v20  ;;  %v390_v14 = vadd.s32 %v2769_v62, %v2776_v0  ;;  %v701_v28 = vadd.s32 1, %v2861_v36 }
  0x5c   : > { %1466 = vperm.xlu1 %2289, %v2331_v19   ;;  %v517_v51 = vand.u32 2147483647, %v516_v4  ;;  %vm2065_vm15 = vcmp.lt.s32.totalorder %v2064_v24, 0  ;;  %v550_v26 = vadd.s32 1, %v2070_v12  ;;  %v420_v32 = vsub.s32 4, %v2813_v60 }
  0x5d   : > { %v405_v23 = vsel %vm2065_vm15, 0, %v2064_v24  ;;  %v698_v9 = vmul.u32 %v2815_v63, %v682_v7  ;;  %vm2887_vm1 = vcmp.le.f32.partialorder %v334_v61, 0.7853982  ;;  %vm700_vm2 = vc.u32 %v2877_v21, %v2860_v54 }
  0x5e   : > { %v520_v22 = vmul.f32 %v519_v5, %v517_v51  ;;  %v406_v38 = vsub.s32 32, %v405_v23  ;;  %v407_v34 = vshll.u32 %v2830_v18, %v405_v23  ;;  %v410_v50 = vsub.s32 4294967266, %v405_v23 }
  0x5f   : > { %vm551_vm0 = vcmp.gt.s32.totalorder %v550_v26, 0  ;;  %v702_v53 = vsel %vm700_vm2, %v701_v28, %v2861_v36  ;;  %v547_v18 = vand.u32 8388607, %v540_v6  ;;  %v2899_v61 = vand.u32 3, %v526_v52 }
  0x60   : > { %2290 = vset.pattern.permute.xlu1 %v2474_v1  ;;  %v521_v13 = vxor.u32 2147483648, %v520_v22  ;;  %v552_v0 = vsel %vm551_vm0, %v550_v26, 0  ;;  %v411_v63 = vadd.s32 127, %v410_v50  ;;  %v703_v31 = vadd.s32 %v702_v53, %v698_v9 }
  0x61   : > { %1635 = vperm.xlu1 %2290, %v2331_v19   ;;  %v408_v19 = vshrl.u32 %v390_v14, %v406_v38  ;;  %v554_v10 = vand.u32 31, %v552_v0  ;;  %v2907_v36 = vsel %vm336_vm14, %v420_v32, %v2813_v60  ;;  %v2909_v5 = vshrl.u32 %v552_v0, 5 }
  0x62   : > { %v522_v29 = vsel %vm439_vm7, %v521_v13, %v520_v22  ;;  %v704_v4 = vadd.s32 536870912, %v703_v31  ;;  %v423_v26 = vsel %vm2887_vm1, 0, %v2907_v36  ;;  %v548_v23 = vor.u32 8388608, %v547_v18 }
  0x63   : > { %v525_v30 = vsel %vm2826_vm11, %v2613_v43, %v522_v29  ;;  %v409_v56 = vor.u32 %v408_v19, %v407_v34  ;;  %v555_v37 = vsub.s32 32, %v554_v10  ;;  %v557_v48 = vshll.u32 %v2476_v33, %v554_v10 }
  0x64   : > { %2332 = vcosq.f32 %v525_v30  ;;  %v2913_v42 = vshrl.u32 %v704_v4, 30  ;;  %v560_v51 = vshll.u32 %v2477_v35, %v554_v10  ;;  %v563_v20 = vshll.u32 %v2478_v40, %v554_v10 }
  0x65   : > { %1639 = vperm.xlu1 %2290, %v2724_v57   ;;  %v412_v57 = vshll.u32 %v411_v63, 23  ;;  %2334 = vsinq.f32 %v525_v30  ;;  %v416_v7 = vcvt.s32.f32 %v409_v56  ;;  %v558_v12 = vshrl.u32 %v2477_v35, %v555_v37 }
  0x66   : > { %v561_v60 = vshrl.u32 %v2478_v40, %v555_v37  ;;  %v564_v14 = vshrl.u32 %v2479_v44, %v555_v37  ;;  %v566_v28 = vshll.u32 %v2479_v44, %v554_v10  ;;  %v706_v22 = vshll.u32 %v2913_v42, 30 }
  0x67   : > { %v413_v24 = vor.u32 4788187, %v412_v57  ;;  %v2926_v32 = vmul.f32 0.62831855, %v2616_v45  ;;  %vm535_vm3 = vcmp.eq.s32.totalorder %v2899_v61, 2  ;;  %v556_v38 = vshrl.u32 %v2476_v33, %v555_v37 }
  0x68   : > { %v567_v34 = vshrl.u32 %v2480_v49, %v555_v37  ;;  %v569_v50 = vshll.u32 %v2480_v49, %v554_v10  ;;  %vm532_vm4 = vcmp.eq.s32.totalorder %v2899_v61, 0  ;;  %v2933_v13 = vsub.s32 %v703_v31, %v706_v22 }
  0x69   : > { %2291 = vset.pattern.permute.xlu1 %v2475_v2  ;;  %v414_v52 = vand.u32 2147483647, %v413_v24  ;;  %v559_v0 = vor.u32 %v558_v12, %v557_v48  ;;  %v562_v19 = vor.u32 %v561_v60, %v560_v51  ;;  %v570_v63 = vshrl.u32 %v2481_v58, %v555_v37 }
  0x6a   : > { %vm531_vm5 = vcmp.lt.s32.totalorder %v2899_v61, 2  ;;  %v565_v18 = vor.u32 %v564_v14, %v563_v20  ;;  %v568_v29 = vor.u32 %v567_v34, %v566_v28  ;;  %vm572_vm6 = vcmp.lt.s32.totalorder %v2909_v5, 1 }
  0x6b   : > { %v417_v9 = vmul.f32 %v416_v7, %v414_v52  ;;  %vm529_vm7 = vweird.f32 %v2613_v43  ;;  %v709_v30 = vsub.s32 0, %v2933_v13  ;;  %vm573_vm8 = vcmp.lt.s32.totalorder %v2909_v5, 2 }
  0x6c   : > { %vm575_vm9 = vcmp.lt.s32.totalorder %v2909_v5, 4  ;;  %v852_v31 = vand.u32 2139095040, %v2926_v32  ;;  %v571_v56 = vor.u32 %v570_v63, %v569_v50  ;;  %vm574_vm10 = vcmp.lt.s32.totalorder %v2909_v5, 3 }
  0x6d   : > { %v418_v53 = vxor.u32 2147483648, %v417_v9  ;;  %v577_v57 = vsel %vm575_vm9, %v565_v18, 2102212464  ;;  %v2075_v4 = vmin.u32 %v709_v30, %v2933_v13  ;;  %v576_v37 = vsel %vm572_vm6, %v556_v38, %v559_v0 }
  0x6e   : > { %v580_v24 = vsel %vm572_vm6, %v559_v0, %v562_v19  ;;  %v578_v7 = vsel %vm574_vm10, %v562_v19, %v577_v57  ;;  %v581_v48 = vsel %vm575_vm9, %v568_v29, 920167782  ;;  %v588_v12 = vshll.u32 %v548_v23, 8 }
  0x6f   : > { %v419_v10 = vsel %vm336_vm14, %v418_v53, %v417_v9  ;;  %v699_v62 = vadd.s32 %v2860_v54, %v2877_v21  ;;  %v711_v51 = vclz %v2075_v4  ;;  %v582_v60 = vsel %vm574_vm10, %v565_v18, %v581_v48 }
  0x70   : > { %v422_v36 = vsel %vm2887_vm1, %v2628_v55, %v419_v10  ;;  %vm315_vm11 = vcmp.lt.f32.partialorder %v2591_v17, 5.0  ;;  %v579_v20 = vsel %vm573_vm8, %v576_v37, %v578_v7  ;;  %v583_v14 = vsel %vm573_vm8, %v580_v24, %v582_v60 }
  0x71   : > { %2336 = vcosq.f32 %v422_v36  ;;  %v2333_v52 = vpop.eup %2332  ;;  %v584_v28 = vsel %vm572_vm6, %v562_v19, %v565_v18  ;;  %v585_v22 = vsel %vm575_vm9, %v571_v56, 1326507024  ;;  %v2076_v23 = vadd.s32 4294967294, %v711_v51 }
  0x72   : > { %2338 = vsinq.f32 %v422_v36  ;;  %v2335_v54 = vpop.eup %2334  ;;  %v536_v21 = vxor.u32 2147483648, %v2333_v52  ;;  %v586_v9 = vsel %vm574_vm10, %v568_v29, %v585_v22  ;;  %v853_v38 = vshrl.u32 %v852_v31, 23 }
  0x73   : > { %v533_v34 = vxor.u32 2147483648, %v2335_v54  ;;  %v587_v50 = vsel %vm573_vm8, %v584_v28, %v586_v9  ;;  %v2977_v0 = vmul.u32.u64.low %v588_v12, %v583_v14  ;;  %v2978_v63 = vmul.u32.u64.high %v588_v12, %v583_v14, %v2977_v0 }
  0x74   : > { %v537_v19 = vsel %vm535_vm3, %v536_v21, %v2335_v54  ;;  %vm2077_vm12 = vcmp.lt.s32.totalorder %v2076_v23, 0  ;;  %v2983_v53 = vmul.u32.u64.low %v588_v12, %v587_v50  ;;  %v2984_v18 = vmul.u32.u64.high %v588_v12, %v587_v50, %v2983_v53 }
  0x75   : > { %v534_v30 = vsel %vm532_vm4, %v2333_v52, %v533_v34  ;;  %v427_v29 = vand.u32 3, %v423_v26  ;;  %v714_v31 = vsel %vm2077_vm12, 0, %v2076_v23  ;;  %v2082_v10 = vadd.s32 4294967169, %v853_v38 }
  0x76   : > { %v538_v5 = vsel %vm531_vm5, %v534_v30, %v537_v19  ;;  %v715_v56 = vsub.s32 32, %v714_v31  ;;  %v716_v57 = vshll.u32 %v2933_v13, %v714_v31  ;;  %v719_v36 = vsub.s32 4294967266, %v714_v31 }
  0x77   : > { %v539_v4 = vsel %vm529_vm7, nan, %v538_v5  ;;  %v595_v37 = vmul.u32 %v588_v12, %v579_v20  ;;  %v598_v24 = vadd.s32 1, %v2978_v63  ;;  %v859_v7 = vadd.s32 1, %v2082_v10 }
  0x78   : > { %v1365_v48 = vadd.f32 1.0, %v539_v4  ;;  %v717_v51 = vshrl.u32 %v699_v62, %v715_v56  ;;  %v720_v60 = vadd.s32 127, %v719_v36  ;;  %v729_v26 = vsub.s32 4, %v2913_v42 }
  0x79   : > { %vm426_vm13 = vweird.f32 %v2628_v55  ;;  %vm645_vm14 = vcmp.lt.s32.totalorder %v2644_v11, 0  ;;  %vm597_vm15 = vc.u32 %v2984_v18, %v2977_v0  ;;  %vm860_vm0 = vcmp.gt.s32.totalorder %v859_v7, 0 }
  0x7a   : > { %v1375_v61 = vmul.f32 0.5, %v1365_v48  ;;  %v718_v43 = vor.u32 %v717_v51, %v716_v57  ;;  %v721_v13 = vshll.u32 %v720_v60, 23  ;;  %v599_v12 = vsel %vm597_vm15, %v598_v24, %v2978_v63 }
  0x7b   : > { %vm432_vm1 = vcmp.eq.s32.totalorder %v427_v29, 2  ;;  %v600_v52 = vadd.s32 %v599_v12, %v595_v37  ;;  %v849_v62 = vand.u32 2147483647, %v2926_v32  ;;  %v861_v20 = vsel %vm860_vm0, %v859_v7, 0 }
  0x7c   : > { %v1385_v28 = vsel %vm315_vm11, %v1375_v61, 0.0  ;;  %vm314_vm2 = vcmp.lt.f32.partialorder %v2589_v16, 5.0  ;;  %v722_v22 = vor.u32 4788187, %v721_v13  ;;  %v725_v54 = vcvt.s32.f32 %v718_v43 }
  0x7d   : > { %v3007_v21 = vsel %vm645_vm14, %v729_v26, %v2913_v42  ;;  %1544 = vperm.xlu1 %2291, %v1385_v28   ;;  %vm429_vm3 = vcmp.eq.s32.totalorder %v427_v29, 0  ;;  %v601_v38 = vadd.s32 536870912, %v600_v52  ;;  %v863_v34 = vand.u32 31, %v861_v20 }
  0x7e   : > { %v2337_v14 = vpop.eup %2336  ;;  %vm428_vm4 = vcmp.lt.s32.totalorder %v427_v29, 2  ;;  %vm3011_vm5 = vcmp.le.f32.partialorder %v643_v25, 0.7853982  ;;  %v723_v63 = vand.u32 2147483647, %v722_v22  ;;  %v3023_v56 = vshrl.u32 %v861_v20, 5 }
  0x7f   : > { %v2339_v23 = vpop.eup %2338  ;;  %v433_v9 = vxor.u32 2147483648, %v2337_v14  ;;  %v732_v42 = vsel %vm3011_vm5, 0, %v3007_v21  ;;  %v3019_v53 = vshrl.u32 %v601_v38, 30  ;;  %v864_v30 = vsub.s32 32, %v863_v34 }
  0x80   : > { %v430_v50 = vxor.u32 2147483648, %v2339_v23  ;;  %v726_v10 = vmul.f32 %v725_v54, %v723_v63  ;;  %v856_v5 = vand.u32 8388607, %v849_v62  ;;  %v866_v57 = vshll.u32 %v2476_v33, %v863_v34 }
  0x81   : > { %v434_v19 = vsel %vm432_vm1, %v433_v9, %v2339_v23  ;;  %2293 = vset.pattern.permute.xlu1 %v2474_v1  ;;  %v603_v29 = vshll.u32 %v3019_v53, 30  ;;  %v869_v36 = vshll.u32 %v2477_v35, %v863_v34  ;;  %v867_v24 = vshrl.u32 %v2477_v35, %v864_v30 }
  0x82   : > { %v431_v31 = vsel %vm429_vm3, %v2337_v14, %v430_v50  ;;  %1697 = vperm.xlu1 %2293, %v1385_v28   ;;  %v727_v37 = vxor.u32 2147483648, %v726_v10  ;;  %v870_v7 = vshrl.u32 %v2478_v40, %v864_v30  ;;  %v872_v60 = vshll.u32 %v2478_v40, %v863_v34 }
  0x83   : > { %v435_v25 = vsel %vm428_vm4, %v431_v31, %v434_v19  ;;  %v3033_v51 = vsub.s32 %v600_v52, %v603_v29  ;;  %v873_v26 = vshrl.u32 %v2479_v44, %v864_v30  ;;  %v857_v43 = vor.u32 8388608, %v856_v5 }
  0x84   : > { %v436_v4 = vsel %vm426_vm13, nan, %v435_v25  ;;  %v728_v61 = vsel %vm645_vm14, %v727_v37, %v726_v10  ;;  %v865_v55 = vshrl.u32 %v2476_v33, %v864_v30  ;;  %vm881_vm6 = vcmp.lt.s32.totalorder %v3023_v56, 1 }
  0x85   : > { %v1364_v48 = vadd.f32 1.0, %v436_v4  ;;  %v731_v12 = vsel %vm3011_vm5, %v2644_v11, %v728_v61  ;;  %v606_v52 = vsub.s32 0, %v3033_v51  ;;  %v868_v20 = vor.u32 %v867_v24, %v866_v57 }
  0x86   : > { %2295 = vset.pattern.permute.xlu1 %v2475_v2  ;;  %2340 = vcosq.f32 %v731_v12  ;;  %v871_v14 = vor.u32 %v870_v7, %v869_v36  ;;  %v875_v28 = vshll.u32 %v2479_v44, %v863_v34  ;;  %v876_v22 = vshrl.u32 %v2480_v49, %v864_v30 }
  0x87   : > { %v1374_v13 = vmul.f32 0.5, %v1364_v48  ;;  %2342 = vsinq.f32 %v731_v12  ;;  %v2071_v23 = vmin.u32 %v606_v52, %v3033_v51  ;;  %v874_v9 = vor.u32 %v873_v26, %v872_v60 }
  0x88   : > { %v877_v38 = vor.u32 %v876_v22, %v875_v28  ;;  %v878_v50 = vshll.u32 %v2480_v49, %v863_v34  ;;  %vm882_vm7 = vcmp.lt.s32.totalorder %v3023_v56, 2  ;;  %v897_v63 = vshll.u32 %v857_v43, 8 }
  0x89   : > { %v1384_v54 = vsel %vm314_vm2, %v1374_v13, 0.0  ;;  %v608_v19 = vclz %v2071_v23  ;;  %v879_v31 = vshrl.u32 %v2481_v58, %v864_v30  ;;  %vm883_vm8 = vcmp.lt.s32.totalorder %v3023_v56, 3 }
  0x8a   : > { %1539 = vperm.xlu0 %2285, %v1384_v54   ;;  %vm884_vm9 = vcmp.lt.s32.totalorder %v3023_v56, 4  ;;  %v885_v16 = vsel %vm881_vm6, %v865_v55, %v868_v20  ;;  %v889_v5 = vsel %vm881_vm6, %v868_v20, %v871_v14  ;;  %v596_v36 = vadd.s32 %v2977_v0, %v2984_v18 }
  0x8b   : > { %v886_v10 = vsel %vm884_vm9, %v874_v9, 2102212464  ;;  %v890_v34 = vsel %vm884_vm9, %v877_v38, 920167782  ;;  %v2072_v25 = vadd.s32 4294967294, %v608_v19  ;;  %v880_v29 = vor.u32 %v879_v31, %v878_v50 }
  0x8c   : > { %v887_v30 = vsel %vm883_vm8, %v871_v14, %v886_v10  ;;  %v891_v57 = vsel %vm883_vm8, %v874_v9, %v890_v34  ;;  %v893_v37 = vsel %vm881_vm6, %v871_v14, %v874_v9  ;;  %v3076_v24 = vmul.f32 0.62831855, %v2609_v41 }
  0x8d   : > { %v892_v4 = vsel %vm882_vm7, %v889_v5, %v891_v57  ;;  %vm2073_vm10 = vcmp.lt.s32.totalorder %v2072_v25, 0  ;;  %v894_v7 = vsel %vm884_vm9, %v880_v29, 1326507024  ;;  %vm735_vm11 = vweird.f32 %v2644_v11 }
  0x8e   : > { %2292 = vset.pattern.permute.xlu0 %v2474_v1  ;;  %v3080_v48 = vmul.u32.u64.low %v897_v63, %v892_v4  ;;  %v3081_v60 = vmul.u32.u64.high %v897_v63, %v892_v4, %v3080_v48  ;;  %v736_v0 = vand.u32 3, %v732_v42  ;;  %v611_v18 = vsel %vm2073_vm10, 0, %v2072_v25 }
  0x8f   : > { %1693 = vperm.xlu0 %2292, %v1384_v54   ;;  %v888_v26 = vsel %vm882_vm7, %v885_v16, %v887_v30  ;;  %v895_v61 = vsel %vm883_vm8, %v877_v38, %v894_v7  ;;  %v612_v43 = vsub.s32 32, %v611_v18  ;;  %v613_v55 = vshll.u32 %v3033_v51, %v611_v18 }
  0x90   : > { %v616_v13 = vsub.s32 4294967266, %v611_v18  ;;  %v896_v12 = vsel %vm882_vm7, %v893_v37, %v895_v61  ;;  %v626_v52 = vsub.s32 4, %v3019_v53  ;;  %v749_v21 = vand.u32 2139095040, %v3076_v24 }
  0x91   : > { %v3097_v17 = vmul.u32.u64.low %v897_v63, %v896_v12  ;;  %v3098_v20 = vmul.u32.u64.high %v897_v63, %v896_v12, %v3097_v17  ;;  %vm542_vm12 = vcmp.lt.s32.totalorder %v2790_v15, 0  ;;  %v614_v42 = vshrl.u32 %v596_v36, %v612_v43 }
  0x92   : > { %v617_v14 = vadd.s32 127, %v616_v13  ;;  %v907_v28 = vadd.s32 1, %v3081_v60  ;;  %vm737_vm13 = vcmp.lt.s32.totalorder %v736_v0, 2  ;;  %vm738_vm14 = vcmp.eq.s32.totalorder %v736_v0, 0 }
  0x93   : > { %2294 = vset.pattern.permute.xlu0 %v2475_v2  ;;  %v904_v51 = vmul.u32 %v897_v63, %v888_v26  ;;  %v750_v56 = vshrl.u32 %v749_v21, 23  ;;  %v2341_v22 = vpop.eup %2340  ;;  %vm741_vm15 = vcmp.eq.s32.totalorder %v736_v0, 2  ;;  %v615_v54 = vor.u32 %v614_v42, %v613_v55 }
  0x94   : > { %v618_v23 = vshll.u32 %v617_v14, 23  ;;  %v746_v9 = vand.u32 2147483647, %v3076_v24  ;;  %v2343_v38 = vpop.eup %2342  ;;  %v742_v50 = vxor.u32 2147483648, %v2341_v22  ;;  %v627_v19 = vsel %vm542_vm12, %v626_v52, %v3019_v53 }
  0x95   : > { %vm906_vm0 = vc.u32 %v3098_v20, %v3080_v48  ;;  %v2078_v31 = vadd.s32 4294967169, %v750_v56  ;;  %v739_v16 = vxor.u32 2147483648, %v2343_v38  ;;  %v622_v63 = vcvt.s32.f32 %v615_v54 }
  0x96   : > { %v619_v10 = vor.u32 4788187, %v618_v23  ;;  %v908_v5 = vsel %vm906_vm0, %v907_v28, %v3081_v60  ;;  %v743_v34 = vsel %vm741_vm15, %v742_v50, %v2343_v38  ;;  %vm3113_vm1 = vcmp.le.f32.partialorder %v540_v6, 0.7853982 }
  0x97   : > { %v909_v29 = vadd.s32 %v908_v5, %v904_v51  ;;  %v756_v30 = vadd.s32 1, %v2078_v31  ;;  %v740_v53 = vsel %vm738_vm14, %v2341_v22, %v739_v16  ;;  %v629_v36 = vsel %vm3113_vm1, 0, %v627_v19 }
  0x98   : > { %v620_v57 = vand.u32 2147483647, %v619_v10  ;;  %v744_v4 = vsel %vm737_vm13, %v740_v53, %v743_v34  ;;  %v753_v7 = vand.u32 8388607, %v746_v9  ;;  %v3126_v26 = vmul.f32 0.62831855, %v2618_v46 }
  0x99   : > { %v910_v37 = vadd.s32 536870912, %v909_v29  ;;  %vm757_vm2 = vcmp.gt.s32.totalorder %v756_v30, 0  ;;  %v745_v6 = vsel %vm735_vm11, nan, %v744_v4  ;;  %vm317_vm3 = vcmp.lt.f32.partialorder %v2597_v27, 5.0 }
  0x9a   : > { %v623_v60 = vmul.f32 %v622_v63, %v620_v57  ;;  %v758_v18 = vsel %vm757_vm2, %v756_v30, 0  ;;  %v1367_v61 = vadd.f32 1.0, %v745_v6  ;;  %v3131_v12 = vand.u32 3, %v629_v36 }
  0x9b   : > { %v3128_v43 = vshrl.u32 %v910_v37, 30  ;;  %v760_v55 = vand.u32 31, %v758_v18  ;;  %v754_v21 = vor.u32 8388608, %v753_v7  ;;  %v955_v14 = vand.u32 2139095040, %v3126_v26 }
  0x9c   : > { %v624_v0 = vxor.u32 2147483648, %v623_v60  ;;  %v1377_v13 = vmul.f32 0.5, %v1367_v61  ;;  %v759_v56 = vshrl.u32 %v758_v18, 5  ;;  %v905_v5 = vadd.s32 %v3080_v48, %v3098_v20 }
  0x9d   : > { %v912_v52 = vshll.u32 %v3128_v43, 30  ;;  %v761_v17 = vsub.s32 32, %v760_v55  ;;  %v763_v42 = vshll.u32 %v2476_v33, %v760_v55  ;;  %v766_v54 = vshll.u32 %v2477_v35, %v760_v55 }
  0x9e   : > { %v625_v11 = vsel %vm542_vm12, %v624_v0, %v623_v60  ;;  %v1387_v28 = vsel %vm317_vm3, %v1377_v13, 0.0  ;;  %v769_v23 = vshll.u32 %v2478_v40, %v760_v55  ;;  %v772_v10 = vshll.u32 %v2479_v44, %v760_v55 }
  0x9f   : > { %v628_v27 = vsel %vm3113_vm1, %v2790_v15, %v625_v11  ;;  %v3141_v51 = vsub.s32 %v909_v29, %v912_v52  ;;  %1554 = vperm.xlu1 %2295, %v1387_v28   ;;  %v764_v22 = vshrl.u32 %v2477_v35, %v761_v17  ;;  %v762_v50 = vshrl.u32 %v2476_v33, %v761_v17 }
  0xa0   : > { %2344 = vcosq.f32 %v628_v27  ;;  %v767_v19 = vshrl.u32 %v2478_v40, %v761_v17  ;;  %v770_v16 = vshrl.u32 %v2479_v44, %v761_v17  ;;  %v773_v63 = vshrl.u32 %v2480_v49, %v761_v17 }
  0xa1   : > { %2346 = vsinq.f32 %v628_v27  ;;  %v915_v38 = vsub.s32 0, %v3141_v51  ;;  %v765_v31 = vor.u32 %v764_v22, %v763_v42  ;;  %v3155_v25 = vshll.u32 %v754_v21, 8 }
  0xa2   : > { %v956_v29 = vshrl.u32 %v955_v14, 23  ;;  %v768_v30 = vor.u32 %v767_v19, %v766_v54  ;;  %v771_v53 = vor.u32 %v770_v16, %v769_v23  ;;  %v774_v57 = vor.u32 %v773_v63, %v772_v10 }
  0xa3   : > { %v2083_v34 = vmin.u32 %v915_v38, %v3141_v51  ;;  %2297 = vset.pattern.permute.xlu1 %v2474_v1  ;;  %v775_v36 = vshll.u32 %v2480_v49, %v760_v55  ;;  %v776_v37 = vshrl.u32 %v2481_v58, %v761_v17  ;;  %vm778_vm4 = vcmp.lt.s32.totalorder %v759_v56, 1 }
  0xa4   : > { %1705 = vperm.xlu1 %2297, %v1387_v28   ;;  %vm779_vm5 = vcmp.lt.s32.totalorder %v759_v56, 2  ;;  %vm780_vm6 = vcmp.lt.s32.totalorder %v759_v56, 3  ;;  %vm781_vm7 = vcmp.lt.s32.totalorder %v759_v56, 4  ;;  %v782_v48 = vsel %vm778_vm4, %v762_v50, %v765_v31 }
  0xa5   : > { %v917_v4 = vclz %v2083_v34  ;;  %v786_v20 = vsel %vm778_vm4, %v765_v31, %v768_v30  ;;  %v777_v6 = vor.u32 %v776_v37, %v775_v36  ;;  %v783_v60 = vsel %vm781_vm7, %v771_v53, 2102212464 }
  0xa6   : > { %v787_v18 = vsel %vm781_vm7, %v774_v57, 920167782  ;;  %vm632_vm8 = vweird.f32 %v2790_v15  ;;  %v784_v61 = vsel %vm780_vm6, %v768_v30, %v783_v60  ;;  %v790_v0 = vsel %vm778_vm4, %v768_v30, %v771_v53 }
  0xa7   : > { %v2084_v7 = vadd.s32 4294967294, %v917_v4  ;;  %v788_v55 = vsel %vm780_vm6, %v771_v53, %v787_v18  ;;  %v2086_v13 = vadd.s32 4294967169, %v956_v29  ;;  %v785_v52 = vsel %vm779_vm5, %v782_v48, %v784_v61 }
  0xa8   : > { %2299 = vset.pattern.permute.xlu1 %v2475_v2  ;;  %v789_v17 = vsel %vm779_vm5, %v786_v20, %v788_v55  ;;  %v791_v11 = vsel %vm781_vm7, %v777_v6, 1326507024  ;;  %vm634_vm10 = vcmp.lt.s32.totalorder %v3131_v12, 2  ;;  %vm635_vm11 = vcmp.eq.s32.totalorder %v3131_v12, 0 }
  0xa9   : > { %vm2085_vm9 = vcmp.lt.s32.totalorder %v2084_v7, 0  ;;  %v792_v42 = vsel %vm780_vm6, %v774_v57, %v791_v11  ;;  %v3171_v14 = vmul.u32.u64.low %v3155_v25, %v789_v17  ;;  %v3172_v28 = vmul.u32.u64.high %v3155_v25, %v789_v17, %v3171_v14 }
  0xaa   : > { %v920_v21 = vsel %vm2085_vm9, 0, %v2084_v7  ;;  %v793_v23 = vsel %vm779_vm5, %v790_v0, %v792_v42  ;;  %vm316_vm12 = vcmp.lt.f32.partialorder %v2607_v39, 5.0  ;;  %vm638_vm13 = vcmp.eq.s32.totalorder %v3131_v12, 2 }
  0xab   : > { %v921_v27 = vsub.s32 32, %v920_v21  ;;  %v922_v22 = vshll.u32 %v3141_v51, %v920_v21  ;;  %v925_v54 = vsub.s32 4294967266, %v920_v21  ;;  %v962_v10 = vadd.s32 1, %v2086_v13 }
  0xac   : > { %v3180_v38 = vmul.u32.u64.low %v3155_v25, %v793_v23  ;;  %v3181_v50 = vmul.u32.u64.high %v3155_v25, %v793_v23, %v3180_v38  ;;  %v801_v56 = vmul.u32 %v3155_v25, %v785_v52  ;;  %v804_v34 = vadd.s32 1, %v3172_v28 }
  0xad   : > { %v2345_v19 = vpop.eup %2344  ;;  %v923_v31 = vshrl.u32 %v905_v5, %v921_v27  ;;  %v926_v16 = vadd.s32 127, %v925_v54  ;;  %v952_v29 = vand.u32 2147483647, %v3126_v26  ;;  %vm3190_vm14 = vcmp.le.f32.partialorder %v849_v62, 0.7853982 }
  0xae   : > { %v2347_v51 = vpop.eup %2346  ;;  %v639_v63 = vxor.u32 2147483648, %v2345_v19  ;;  %vm963_vm15 = vcmp.gt.s32.totalorder %v962_v10, 0  ;;  %v935_v4 = vsub.s32 4, %v3128_v43  ;;  %vm803_vm0 = vc.u32 %v3181_v50, %v3171_v14 }
  0xaf   : > { %v636_v30 = vxor.u32 2147483648, %v2347_v51  ;;  %v924_v57 = vor.u32 %v923_v31, %v922_v22  ;;  %v927_v36 = vshll.u32 %v926_v16, 23  ;;  %v964_v25 = vsel %vm963_vm15, %v962_v10, 0 }
  0xb0   : > { %v640_v5 = vsel %vm638_vm13, %v639_v63, %v2347_v51  ;;  %v805_v62 = vsel %vm803_vm0, %v804_v34, %v3172_v28  ;;  %v966_v60 = vand.u32 31, %v964_v25  ;;  %v3203_v18 = vmul.f32 0.62831855, %v2620_v47 }
  0xb1   : > { %v637_v37 = vsel %vm635_vm11, %v2345_v19, %v636_v30  ;;  %v928_v48 = vor.u32 4788187, %v927_v36  ;;  %v931_v20 = vcvt.s32.f32 %v924_v57  ;;  %v806_v6 = vadd.s32 %v805_v62, %v801_v56 }
  0xb2   : > { %v641_v7 = vsel %vm634_vm10, %v637_v37, %v640_v5  ;;  %vm851_vm1 = vcmp.lt.s32.totalorder %v2926_v32, 0  ;;  %v959_v0 = vand.u32 8388607, %v952_v29  ;;  %v967_v17 = vsub.s32 32, %v966_v60 }
  0xb3   : > { %v642_v61 = vsel %vm632_vm8, nan, %v641_v7  ;;  %v929_v55 = vand.u32 2147483647, %v928_v48  ;;  %v936_v12 = vsel %vm851_vm1, %v935_v4, %v3128_v43  ;;  %v807_v52 = vadd.s32 536870912, %v806_v6 }
  0xb4   : > { %v1366_v13 = vadd.f32 1.0, %v642_v61  ;;  %v969_v21 = vshll.u32 %v2476_v33, %v966_v60  ;;  %v972_v42 = vshll.u32 %v2477_v35, %v966_v60  ;;  %v975_v15 = vshll.u32 %v2478_v40, %v966_v60 }
  0xb5   : > { %v932_v11 = vmul.f32 %v931_v20, %v929_v55  ;;  %v3216_v27 = vshrl.u32 %v807_v52, 30  ;;  %v970_v22 = vshrl.u32 %v2477_v35, %v967_v17  ;;  %v978_v54 = vshll.u32 %v2479_v44, %v966_v60 }
  0xb6   : > { %v1376_v28 = vmul.f32 0.5, %v1366_v13  ;;  %v973_v38 = vshrl.u32 %v2478_v40, %v967_v17  ;;  %v976_v43 = vshrl.u32 %v2479_v44, %v967_v17  ;;  %v979_v19 = vshrl.u32 %v2480_v49, %v967_v17 }
  0xb7   : > { %v933_v23 = vxor.u32 2147483648, %v932_v11  ;;  %v938_v16 = vsel %vm3190_vm14, 0, %v936_v12  ;;  %v809_v10 = vshll.u32 %v3216_v27, 30  ;;  %v965_v51 = vshrl.u32 %v964_v25, 5 }
  0xb8   : > { %v1386_v31 = vsel %vm316_vm12, %v1376_v28, 0.0  ;;  %v960_v56 = vor.u32 8388608, %v959_v0  ;;  %v968_v34 = vshrl.u32 %v2476_v33, %v967_v17  ;;  %v971_v30 = vor.u32 %v970_v22, %v969_v21 }
  0xb9   : > { %1549 = vperm.xlu0 %2294, %v1386_v31   ;;  %v934_v63 = vsel %vm851_vm1, %v933_v23, %v932_v11  ;;  %v3234_v39 = vsub.s32 %v806_v6, %v809_v10  ;;  %v974_v36 = vor.u32 %v973_v38, %v972_v42  ;;  %v981_v5 = vshll.u32 %v2480_v49, %v966_v60 }
  0xba   : > { %v937_v57 = vsel %vm3190_vm14, %v2926_v32, %v934_v63  ;;  %v977_v4 = vor.u32 %v976_v43, %v975_v15  ;;  %v980_v25 = vor.u32 %v979_v19, %v978_v54  ;;  %v982_v37 = vshrl.u32 %v2481_v58, %v967_v17 }
  0xbb   : > { %2348 = vcosq.f32 %v937_v57  ;;  %v3238_v48 = vand.u32 3, %v938_v16  ;;  %v812_v20 = vsub.s32 0, %v3234_v39  ;;  %vm984_vm2 = vcmp.lt.s32.totalorder %v965_v51, 1 }
  0xbc   : > { %2350 = vsinq.f32 %v937_v57  ;;  %v983_v53 = vor.u32 %v982_v37, %v981_v5  ;;  %vm986_vm3 = vcmp.lt.s32.totalorder %v965_v51, 3  ;;  %vm987_vm4 = vcmp.lt.s32.totalorder %v965_v51, 4 }
  0xbd   : > { %2296 = vset.pattern.permute.xlu0 %v2474_v1  ;;  %v1058_v62 = vand.u32 2139095040, %v3203_v18  ;;  %v2079_v7 = vmin.u32 %v812_v20, %v3234_v39  ;;  %vm985_vm5 = vcmp.lt.s32.totalorder %v965_v51, 2  ;;  %v988_v6 = vsel %vm984_vm2, %v968_v34, %v971_v30 }
  0xbe   : > { %1701 = vperm.xlu0 %2296, %v1386_v31   ;;  %v1000_v60 = vshll.u32 %v960_v56, 8  ;;  %v989_v61 = vsel %vm987_vm4, %v977_v4, 2102212464  ;;  %v992_v55 = vsel %vm984_vm2, %v971_v30, %v974_v36  ;;  %v993_v0 = vsel %vm987_vm4, %v980_v25, 920167782 }
  0xbf   : > { %v996_v13 = vsel %vm984_vm2, %v974_v36, %v977_v4  ;;  %v814_v12 = vclz %v2079_v7  ;;  %v990_v52 = vsel %vm986_vm3, %v974_v36, %v989_v61  ;;  %v994_v17 = vsel %vm986_vm3, %v977_v4, %v993_v0 }
  0xc0   : > { %v997_v11 = vsel %vm987_vm4, %v983_v53, 1326507024  ;;  %v991_v21 = vsel %vm985_vm5, %v988_v6, %v990_v52  ;;  %v995_v42 = vsel %vm985_vm5, %v992_v55, %v994_v17  ;;  %v1059_v28 = vshrl.u32 %v1058_v62, 23 }
  0xc1   : > { %v998_v15 = vsel %vm986_vm3, %v980_v25, %v997_v11  ;;  %v2080_v22 = vadd.s32 4294967294, %v814_v12  ;;  %v3251_v23 = vmul.u32.u64.low %v1000_v60, %v995_v42  ;;  %v3252_v38 = vmul.u32.u64.high %v1000_v60, %v995_v42, %v3251_v23 }
  0xc2   : > { %2298 = vset.pattern.permute.xlu0 %v2475_v2  ;;  %v999_v54 = vsel %vm985_vm5, %v996_v13, %v998_v15  ;;  %vm748_vm6 = vcmp.lt.s32.totalorder %v3076_v24, 0  ;;  %v2090_v31 = vadd.s32 4294967169, %v1059_v28  ;;  %vm943_vm7 = vcmp.lt.s32.totalorder %v3238_v48, 2 }
  0xc3   : > { %v3256_v43 = vmul.u32.u64.low %v1000_v60, %v999_v54  ;;  %v3257_v19 = vmul.u32.u64.high %v1000_v60, %v999_v54, %v3256_v43  ;;  %v802_v16 = vadd.s32 %v3171_v14, %v3181_v50  ;;  %vm2081_vm8 = vcmp.lt.s32.totalorder %v2080_v22, 0 }
  0xc4   : > { %v1055_v10 = vand.u32 2147483647, %v3203_v18  ;;  %v817_v51 = vsel %vm2081_vm8, 0, %v2080_v22  ;;  %v832_v63 = vsub.s32 4, %v3216_v27  ;;  %v1007_v56 = vmul.u32 %v1000_v60, %v991_v21 }
  0xc5   : > { %v1065_v34 = vadd.s32 1, %v2090_v31  ;;  %v818_v30 = vsub.s32 32, %v817_v51  ;;  %v819_v57 = vshll.u32 %v3234_v39, %v817_v51  ;;  %v822_v36 = vsub.s32 4294967266, %v817_v51 }
  0xc6   : > { %v1010_v5 = vadd.s32 1, %v3252_v38  ;;  %vm944_vm9 = vcmp.eq.s32.totalorder %v3238_v48, 0  ;;  %vm947_vm10 = vcmp.eq.s32.totalorder %v3238_v48, 2  ;;  %vm1009_vm11 = vc.u32 %v3257_v19, %v3251_v23 }
  0xc7   : > { %vm1066_vm12 = vcmp.gt.s32.totalorder %v1065_v34, 0  ;;  %vm319_vm13 = vcmp.lt.f32.partialorder %v2616_v45, 5.0  ;;  %v820_v50 = vshrl.u32 %v802_v16, %v818_v30  ;;  %v823_v4 = vadd.s32 127, %v822_v36 }
  0xc8   : > { %v2349_v14 = vpop.eup %2348  ;;  %v1011_v25 = vsel %vm1009_vm11, %v1010_v5, %v3252_v38  ;;  %v1067_v37 = vsel %vm1066_vm12, %v1065_v34, 0  ;;  %v1062_v62 = vand.u32 8388607, %v1055_v10  ;;  %v3277_v55 = vsel %vm748_vm6, %v832_v63, %v3216_v27 }
  0xc9   : > { %v2351_v39 = vpop.eup %2350  ;;  %v948_v20 = vxor.u32 2147483648, %v2349_v14  ;;  %v1012_v53 = vadd.s32 %v1011_v25, %v1007_v56  ;;  %v1069_v7 = vand.u32 31, %v1067_v37  ;;  %v821_v60 = vor.u32 %v820_v50, %v819_v57 }
  0xca   : > { %v945_v6 = vxor.u32 2147483648, %v2351_v39  ;;  %v824_v61 = vshll.u32 %v823_v4, 23  ;;  %vm941_vm14 = vweird.f32 %v2926_v32  ;;  %vm3286_vm15 = vcmp.le.f32.partialorder %v746_v9, 0.7853982 }
  0xcb   : > { %v949_v0 = vsel %vm947_vm10, %v948_v20, %v2351_v39  ;;  %v1013_v13 = vadd.s32 536870912, %v1012_v53  ;;  %v1070_v12 = vsub.s32 32, %v1069_v7  ;;  %v828_v21 = vcvt.s32.f32 %v821_v60 }
  0xcc   : > { %v946_v52 = vsel %vm944_vm9, %v2349_v14, %v945_v6  ;;  %v825_v11 = vor.u32 4788187, %v824_v61  ;;  %v835_v32 = vsel %vm3286_vm15, 0, %v3277_v55  ;;  %v1063_v15 = vor.u32 8388608, %v1062_v62 }
  0xcd   : > { %v950_v27 = vsel %vm943_vm7, %v946_v52, %v949_v0  ;;  %v3295_v42 = vshrl.u32 %v1013_v13, 30  ;;  %v1072_v54 = vshll.u32 %v2476_v33, %v1069_v7  ;;  %v1075_v9 = vshll.u32 %v2477_v35, %v1069_v7 }
  0xce   : > { %v951_v28 = vsel %vm941_vm14, nan, %v950_v27  ;;  %v826_v22 = vand.u32 2147483647, %v825_v11  ;;  %v1073_v31 = vshrl.u32 %v2477_v35, %v1070_v12  ;;  %v1076_v48 = vshrl.u32 %v2478_v40, %v1070_v12 }
  0xcf   : > { %v1369_v38 = vadd.f32 1.0, %v951_v28  ;;  %v1015_v43 = vshll.u32 %v3295_v42, 30  ;;  %v1078_v51 = vshll.u32 %v2478_v40, %v1069_v7  ;;  %v1079_v63 = vshrl.u32 %v2479_v44, %v1070_v12 }
  0xd0   : > { %v829_v16 = vmul.f32 %v828_v21, %v826_v22  ;;  %v1081_v56 = vshll.u32 %v2479_v44, %v1069_v7  ;;  %v1068_v57 = vshrl.u32 %v1067_v37, 5  ;;  %v1082_v36 = vshrl.u32 %v2480_v49, %v1070_v12 }
  0xd1   : > { %v1379_v34 = vmul.f32 0.5, %v1369_v38  ;;  %v3305_v30 = vsub.s32 %v1012_v53, %v1015_v43  ;;  %v1071_v14 = vshrl.u32 %v2476_v33, %v1070_v12  ;;  %v1084_v50 = vshll.u32 %v2480_v49, %v1069_v7 }
  0xd2   : > { %v830_v5 = vxor.u32 2147483648, %v829_v16  ;;  %v3311_v4 = vmul.f32 0.62831855, %v2639_v8  ;;  %v1074_v20 = vor.u32 %v1073_v31, %v1072_v54  ;;  %v1077_v62 = vor.u32 %v1076_v48, %v1075_v9 }
  0xd3   : > { %v1389_v25 = vsel %vm319_vm13, %v1379_v34, 0.0  ;;  %v1018_v39 = vsub.s32 0, %v3305_v30  ;;  %v1080_v53 = vor.u32 %v1079_v63, %v1078_v51  ;;  %v1083_v6 = vor.u32 %v1082_v36, %v1081_v56 }
  0xd4   : > { %1564 = vperm.xlu1 %2299, %v1389_v25   ;;  %v831_v37 = vsel %vm748_vm6, %v830_v5, %v829_v16  ;;  %v1085_v60 = vshrl.u32 %v2481_v58, %v1070_v12  ;;  %vm1087_vm0 = vcmp.lt.s32.totalorder %v1068_v57, 1  ;;  %v1103_v45 = vshll.u32 %v1063_v15, 8 }
  0xd5   : > { %v834_v7 = vsel %vm3286_vm15, %v3076_v24, %v831_v37  ;;  %v2087_v61 = vmin.u32 %v1018_v39, %v3305_v30  ;;  %vm1088_vm1 = vcmp.lt.s32.totalorder %v1068_v57, 2  ;;  %vm1089_vm2 = vcmp.lt.s32.totalorder %v1068_v57, 3 }
  0xd6   : > { %2352 = vcosq.f32 %v834_v7  ;;  %v1086_v0 = vor.u32 %v1085_v60, %v1084_v50  ;;  %vm1090_vm3 = vcmp.lt.s32.totalorder %v1068_v57, 4  ;;  %v1091_v52 = vsel %vm1087_vm0, %v1071_v14, %v1074_v20 }
  0xd7   : > { %2354 = vsinq.f32 %v834_v7  ;;  %v1020_v13 = vclz %v2087_v61  ;;  %v1092_v11 = vsel %vm1090_vm3, %v1080_v53, 2102212464  ;;  %v1095_v12 = vsel %vm1087_vm0, %v1074_v20, %v1077_v62 }
  0xd8   : > { %2301 = vset.pattern.permute.xlu1 %v2474_v1  ;;  %v1096_v21 = vsel %vm1090_vm3, %v1083_v6, 920167782  ;;  %v1099_v27 = vsel %vm1087_vm0, %v1077_v62, %v1080_v53  ;;  %v1093_v22 = vsel %vm1089_vm2, %v1077_v62, %v1092_v11  ;;  %v1100_v54 = vsel %vm1090_vm3, %v1086_v0, 1326507024 }
  0xd9   : > { %1713 = vperm.xlu1 %2301, %v1389_v25   ;;  %v2088_v28 = vadd.s32 4294967294, %v1020_v13  ;;  %v1097_v15 = vsel %vm1089_vm2, %v1080_v53, %v1096_v21  ;;  %v1008_v9 = vadd.s32 %v3251_v23, %v3257_v19  ;;  %v1094_v38 = vsel %vm1088_vm1, %v1091_v52, %v1093_v22  ;;  %v3364_v13 = vpop.permute.xlu1 %1603 }
  0xda   : > { %v1098_v43 = vsel %vm1088_vm1, %v1095_v12, %v1097_v15  ;;  %v1101_v31 = vsel %vm1089_vm2, %v1083_v6, %v1100_v54  ;;  %vm838_vm5 = vweird.f32 %v3076_v24  ;;  %v839_v57 = vand.u32 3, %v835_v32 }
  0xdb   : > { %vm2089_vm4 = vcmp.lt.s32.totalorder %v2088_v28, 0  ;;  %v1102_v48 = vsel %vm1088_vm1, %v1099_v27, %v1101_v31  ;;  %v3332_v16 = vmul.u32.u64.low %v1103_v45, %v1098_v43  ;;  %v3333_v51 = vmul.u32.u64.high %v1103_v45, %v1098_v43, %v3332_v16 }
  0xdc   : > { %v1023_v63 = vsel %vm2089_vm4, 0, %v2088_v28  ;;  %v3336_v56 = vmul.u32.u64.low %v1103_v45, %v1102_v48  ;;  %v3337_v34 = vmul.u32.u64.high %v1103_v45, %v1102_v48, %v3336_v56  ;;  %v1110_v5 = vmul.u32 %v1103_v45, %v1094_v38 }
  0xdd   : > { %2302 = vset.pattern.permute.xlu1 %v2475_v2  ;;  %v1024_v23 = vsub.s32 32, %v1023_v63  ;;  %v1025_v19 = vshll.u32 %v3305_v30, %v1023_v63  ;;  %v1028_v36 = vsub.s32 4294967266, %v1023_v63  ;;  %v1161_v14 = vand.u32 2139095040, %v3311_v4 }
  0xde   : > { %v1113_v39 = vadd.s32 1, %v3333_v51  ;;  %v3349_v20 = vmul.f32 0.62831855, %v2632_v59  ;;  %vm954_vm6 = vcmp.lt.s32.totalorder %v3126_v26, 0  ;;  %v1038_v30 = vsub.s32 4, %v3295_v42 }
  0xdf   : > { %v1026_v50 = vshrl.u32 %v1008_v9, %v1024_v23  ;;  %v1029_v25 = vadd.s32 127, %v1028_v36  ;;  %vm1112_vm7 = vc.u32 %v3337_v34, %v3332_v16  ;;  %v1162_v17 = vshrl.u32 %v1161_v14, 23  ;;  %v3380_v36 = vpop.permute.xlu1 %1607 }
  0xe0   : > { %v1114_v62 = vsel %vm1112_vm7, %v1113_v39, %v3333_v51  ;;  %v1158_v37 = vand.u32 2147483647, %v3311_v4  ;;  %vm841_vm8 = vcmp.eq.s32.totalorder %v839_v57, 0  ;;  %vm3359_vm9 = vcmp.le.f32.partialorder %v952_v29, 0.7853982 }
  0xe1   : > { %v1027_v55 = vor.u32 %v1026_v50, %v1025_v19  ;;  %v1030_v32 = vshll.u32 %v1029_v25, 23  ;;  %v1115_v6 = vadd.s32 %v1114_v62, %v1110_v5  ;;  %v2094_v60 = vadd.s32 4294967169, %v1162_v17 }
  0xe2   : > { %vm844_vm10 = vcmp.eq.s32.totalorder %v839_v57, 2  ;;  %v1264_v0 = vand.u32 2139095040, %v3349_v20  ;;  %v1039_v12 = vsel %vm954_vm6, %v1038_v30, %v3295_v42  ;;  %vm840_vm11 = vcmp.lt.s32.totalorder %v839_v57, 2 }
  0xe3   : > { %v2353_v7 = vpop.eup %2352  ;;  %v1031_v61 = vor.u32 4788187, %v1030_v32  ;;  %v1034_v45 = vcvt.s32.f32 %v1027_v55  ;;  %v1116_v29 = vadd.s32 536870912, %v1115_v6  ;;  %v1168_v21 = vadd.s32 1, %v2094_v60 }
  0xe4   : > { %v2355_v52 = vpop.eup %2354  ;;  %v845_v11 = vxor.u32 2147483648, %v2353_v7  ;;  %v1165_v22 = vand.u32 8388607, %v1158_v37  ;;  %v1265_v9 = vshrl.u32 %v1264_v0, 23  ;;  %v1041_v31 = vsel %vm3359_vm9, 0, %v1039_v12 }
  0xe5   : > { %v842_v27 = vxor.u32 2147483648, %v2355_v52  ;;  %v1032_v28 = vand.u32 2147483647, %v1031_v61  ;;  %v3371_v54 = vshrl.u32 %v1116_v29, 30  ;;  %vm1169_vm12 = vcmp.gt.s32.totalorder %v1168_v21, 0  ;;  %v3401_v61 = vpop.permute.xlu1 %1441 }
  0xe6   : > { %v846_v15 = vsel %vm844_vm10, %v845_v11, %v2355_v52  ;;  %v1170_v42 = vsel %vm1169_vm12, %v1168_v21, 0  ;;  %vm318_vm13 = vcmp.lt.f32.partialorder %v2609_v41, 5.0  ;;  %v1166_v23 = vor.u32 8388608, %v1165_v22 }
  0xe7   : > { %v843_v38 = vsel %vm841_vm8, %v2353_v7, %v842_v27  ;;  %v1035_v43 = vmul.f32 %v1034_v45, %v1032_v28  ;;  %v1118_v51 = vshll.u32 %v3371_v54, 30  ;;  %v1172_v19 = vand.u32 31, %v1170_v42 }
  0xe8   : > { %v847_v48 = vsel %vm840_vm11, %v843_v38, %v846_v15  ;;  %v3382_v5 = vand.u32 3, %v1041_v31  ;;  %v2098_v50 = vadd.s32 4294967169, %v1265_v9  ;;  %v3388_v39 = vshrl.u32 %v1170_v42, 5 }
  0xe9   : > { %v848_v63 = vsel %vm838_vm5, nan, %v847_v48  ;;  %v1036_v56 = vxor.u32 2147483648, %v1035_v43  ;;  %v3384_v14 = vsub.s32 %v1115_v6, %v1118_v51  ;;  %v1173_v30 = vsub.s32 32, %v1172_v19  ;;  %v3421_v42 = vpop.permute.xlu1 %1615 }
  0xea   : > { %v1368_v57 = vadd.f32 1.0, %v848_v63  ;;  %v1175_v24 = vshll.u32 %v2476_v33, %v1172_v19  ;;  %v1111_v32 = vadd.s32 %v3332_v16, %v3337_v34  ;;  %v1178_v60 = vshll.u32 %v2477_v35, %v1172_v19 }
  0xeb   : > { %v1037_v25 = vsel %vm954_vm6, %v1036_v56, %v1035_v43  ;;  %v1121_v62 = vsub.s32 0, %v3384_v14  ;;  %v1176_v6 = vshrl.u32 %v2477_v35, %v1173_v30  ;;  %v3399_v7 = vshll.u32 %v1166_v23, 8 }
  0xec   : > { %v1378_v17 = vmul.f32 0.5, %v1368_v57  ;;  %v1040_v55 = vsel %vm3359_vm9, %v3126_v26, %v1037_v25  ;;  %v1271_v0 = vadd.s32 1, %v2098_v50  ;;  %v1174_v16 = vshrl.u32 %v2476_v33, %v1173_v30 }
  0xed   : > { %2356 = vcosq.f32 %v1040_v55  ;;  %v2091_v53 = vmin.u32 %v1121_v62, %v3384_v14  ;;  %v1177_v34 = vor.u32 %v1176_v6, %v1175_v24  ;;  %v1179_v52 = vshrl.u32 %v2478_v40, %v1173_v30 }
  0xee   : > { %v1388_v45 = vsel %vm318_vm13, %v1378_v17, 0.0  ;;  %2358 = vsinq.f32 %v1040_v55  ;;  %vm1190_vm14 = vcmp.lt.s32.totalorder %v3388_v39, 1  ;;  %v1181_v12 = vshll.u32 %v2478_v40, %v1172_v19 }
  0xef   : > { %1559 = vperm.xlu0 %2298, %v1388_v45   ;;  %v1123_v11 = vclz %v2091_v53  ;;  %v1182_v29 = vshrl.u32 %v2479_v44, %v1173_v30  ;;  %v1184_v41 = vshll.u32 %v2479_v44, %v1172_v19  ;;  %v1180_v21 = vor.u32 %v1179_v52, %v1178_v60 }
  0xf0   : > { %v1185_v27 = vshrl.u32 %v2480_v49, %v1173_v30  ;;  %v1187_v28 = vshll.u32 %v2480_v49, %v1172_v19  ;;  %v1188_v22 = vshrl.u32 %v2481_v58, %v1173_v30  ;;  %vm1191_vm15 = vcmp.lt.s32.totalorder %v3388_v39, 2 }
  0xf1   : > { %v2092_v15 = vadd.s32 4294967294, %v1123_v11  ;;  %v1183_v9 = vor.u32 %v1182_v29, %v1181_v12  ;;  %vm1192_vm0 = vcmp.lt.s32.totalorder %v3388_v39, 3  ;;  %vm1193_vm1 = vcmp.lt.s32.totalorder %v3388_v39, 4  ;;  %v3454_v11 = vpop.permute.xlu1 %1446 }
  0xf2   : > { %v1186_v38 = vor.u32 %v1185_v27, %v1184_v41  ;;  %v1189_v43 = vor.u32 %v1188_v22, %v1187_v28  ;;  %v1194_v31 = vsel %vm1190_vm14, %v1174_v16, %v1177_v34  ;;  %vm1046_vm2 = vcmp.lt.s32.totalorder %v3382_v5, 2 }
  0xf3   : > { %2300 = vset.pattern.permute.xlu0 %v2474_v1  ;;  %vm2093_vm3 = vcmp.lt.s32.totalorder %v2092_v15, 0  ;;  %v1195_v48 = vsel %vm1193_vm1, %v1183_v9, 2102212464  ;;  %v1198_v51 = vsel %vm1190_vm14, %v1177_v34, %v1180_v21  ;;  %v1202_v63 = vsel %vm1190_vm14, %v1180_v21, %v1183_v9 }
  0xf4   : > { %1709 = vperm.xlu0 %2300, %v1388_v45   ;;  %vm1044_vm4 = vweird.f32 %v3126_v26  ;;  %v1126_v56 = vsel %vm2093_vm3, 0, %v2092_v15  ;;  %v1196_v23 = vsel %vm1192_vm0, %v1180_v21, %v1195_v48  ;;  %v1199_v19 = vsel %vm1193_vm1, %v1186_v38, 920167782 }
  0xf5   : > { %v1203_v57 = vsel %vm1193_vm1, %v1189_v43, 1326507024  ;;  %v1127_v50 = vsub.s32 32, %v1126_v56  ;;  %v1128_v25 = vshll.u32 %v3384_v14, %v1126_v56  ;;  %v1131_v30 = vsub.s32 4294967266, %v1126_v56 }
  0xf6   : > { %v1261_v24 = vand.u32 2147483647, %v3349_v20  ;;  %v1197_v17 = vsel %vm1191_vm15, %v1194_v31, %v1196_v23  ;;  %v1200_v55 = vsel %vm1192_vm0, %v1183_v9, %v1199_v19  ;;  %v1204_v62 = vsel %vm1192_vm0, %v1186_v38, %v1203_v57 }
  0xf7   : > { %vm1272_vm5 = vcmp.gt.s32.totalorder %v1271_v0, 0  ;;  %v1129_v6 = vshrl.u32 %v1111_v32, %v1127_v50  ;;  %v1132_v60 = vadd.s32 127, %v1131_v30  ;;  %v1201_v14 = vsel %vm1191_vm15, %v1198_v51, %v1200_v55  ;;  %v3482_v50 = vpop.permute.xlu1 %1619 }
  0xf8   : > { %2303 = vset.pattern.permute.xlu0 %v2475_v2  ;;  %v1205_v45 = vsel %vm1191_vm15, %v1202_v63, %v1204_v62  ;;  %vm1057_vm6 = vcmp.lt.s32.totalorder %v3203_v18, 0  ;;  %v3450_v34 = vmul.u32.u64.low %v3399_v7, %v1201_v14  ;;  %v3451_v52 = vmul.u32.u64.high %v3399_v7, %v1201_v14, %v3450_v34 }
  0xf9   : > { %v3446_v53 = vmul.u32.u64.low %v3399_v7, %v1205_v45  ;;  %v3447_v16 = vmul.u32.u64.high %v3399_v7, %v1205_v45, %v3446_v53  ;;  %vm320_vm7 = vcmp.lt.f32.partialorder %v2618_v46, 5.0  ;;  %vm1050_vm8 = vcmp.eq.s32.totalorder %v3382_v5, 2 }
  0xfa   : > { %v2357_v32 = vpop.eup %2356  ;;  %vm3460_vm9 = vcmp.le.f32.partialorder %v1055_v10, 0.7853982  ;;  %v1130_v12 = vor.u32 %v1129_v6, %v1128_v25  ;;  %v1133_v29 = vshll.u32 %v1132_v60, 23  ;;  %v1273_v41 = vsel %vm1272_vm5, %v1271_v0, 0 }
  0xfb   : > { %v2359_v21 = vpop.eup %2358  ;;  %vm1047_vm10 = vcmp.eq.s32.totalorder %v3382_v5, 0  ;;  %v1051_v27 = vxor.u32 2147483648, %v2357_v32  ;;  %v1268_v28 = vand.u32 8388607, %v1261_v24  ;;  %v1275_v22 = vand.u32 31, %v1273_v41 }
  0xfc   : > { %v1048_v15 = vxor.u32 2147483648, %v2359_v21  ;;  %v1134_v9 = vor.u32 4788187, %v1133_v29  ;;  %v1137_v38 = vcvt.s32.f32 %v1130_v12  ;;  %v1213_v10 = vmul.u32 %v3399_v7, %v1197_v17 }
  0xfd   : > { %v1052_v43 = vsel %vm1050_vm8, %v1051_v27, %v2359_v21  ;;  %v1141_v31 = vsub.s32 4, %v3371_v54  ;;  %vm1215_vm11 = vc.u32 %v3447_v16, %v3450_v34  ;;  %v1216_v0 = vadd.s32 1, %v3451_v52 }
  0xfe   : > { %v1049_v48 = vsel %vm1047_vm10, %v2357_v32, %v1048_v15  ;;  %v1135_v51 = vand.u32 2147483647, %v1134_v9  ;;  %v3475_v63 = vshrl.u32 %v1273_v41, 5  ;;  %v1276_v56 = vsub.s32 32, %v1275_v22  ;;  %v3508_v9 = vpop.permute.xlu0 %1426 }
  0xff   : > { %v1053_v23 = vsel %vm1046_vm2, %v1049_v48, %v1052_v43  ;;  %v1217_v7 = vsel %vm1215_vm11, %v1216_v0, %v3451_v52  ;;  %v1278_v19 = vshll.u32 %v2476_v33, %v1275_v22  ;;  %v1281_v57 = vshll.u32 %v2477_v35, %v1275_v22 }
 0x100   : > { %v1054_v25 = vsel %vm1044_vm4, nan, %v1053_v23  ;;  %v1138_v30 = vmul.f32 %v1137_v38, %v1135_v51  ;;  %v1218_v17 = vadd.s32 %v1217_v7, %v1213_v10  ;;  %v1284_v55 = vshll.u32 %v2478_v40, %v1275_v22 }
 0x101   : > { %v1370_v62 = vadd.f32 1.0, %v1054_v25  ;;  %v1279_v6 = vshrl.u32 %v2477_v35, %v1276_v56  ;;  %v1282_v5 = vshrl.u32 %v2478_v40, %v1276_v56  ;;  %v1285_v60 = vshrl.u32 %v2479_v44, %v1276_v56 }
 0x102   : > { %v1139_v14 = vxor.u32 2147483648, %v1138_v30  ;;  %v1219_v45 = vadd.s32 536870912, %v1218_v17  ;;  %v1287_v53 = vshll.u32 %v2479_v44, %v1275_v22  ;;  %v1288_v52 = vshrl.u32 %v2480_v49, %v1276_v56  ;;  %v3541_v39 = vpop.permute.xlu0 %1431 }
 0x103   : > { %v1380_v32 = vmul.f32 0.5, %v1370_v62  ;;  %v1142_v26 = vsel %vm1057_vm6, %v1141_v31, %v3371_v54  ;;  %v1269_v12 = vor.u32 8388608, %v1268_v28  ;;  %v1280_v29 = vor.u32 %v1279_v6, %v1278_v19  ;;  %v3506_v28 = vpop.permute.xlu1 %1623 }
 0x104   : > { %v1140_v35 = vsel %vm1057_vm6, %v1139_v14, %v1138_v30  ;;  %v3497_v41 = vshrl.u32 %v1219_v45, 30  ;;  %v1283_v40 = vor.u32 %v1282_v5, %v1281_v57  ;;  %v1290_v21 = vshll.u32 %v2480_v49, %v1275_v22  ;;  %v305_v49 = vld [vmem:[%s3891_s2] sm:$0x1] }
 0x105   : > { %v1390_v44 = vsel %vm320_vm7, %v1380_v32, 0.0  ;;  %v1143_v27 = vsel %vm3460_vm9, %v3203_v18, %v1140_v35  ;;  %v1289_v15 = vor.u32 %v1288_v52, %v1287_v53  ;;  %v1291_v54 = vshrl.u32 %v2481_v58, %v1276_v56  ;;  %v3560_v53 = vld [vmem:[%s3890_s1] ss:$0 sm:$0xff] }
 0x106   : > { %1569 = vperm.xlu1 %2302, %v1390_v44   ;;  %2360 = vcosq.f32 %v1143_v27  ;;  %v1221_v38 = vshll.u32 %v3497_v41, 30  ;;  %v1286_v10 = vor.u32 %v1285_v60, %v1284_v55  ;;  %vm1293_vm12 = vcmp.lt.s32.totalorder %v3475_v63, 1 }
 0x107   : > { %2362 = vsinq.f32 %v1143_v27  ;;  %v1292_v46 = vor.u32 %v1291_v54, %v1290_v21  ;;  %vm1295_vm13 = vcmp.lt.s32.totalorder %v3475_v63, 3  ;;  %vm1296_vm14 = vcmp.lt.s32.totalorder %v3475_v63, 4  ;;  %v3527_v51 = vpop.permute.xlu1 %1456 }
 0x108   : > { %v3517_v58 = vsub.s32 %v1218_v17, %v1221_v38  ;;  %v1277_v22 = vshrl.u32 %v2476_v33, %v1276_v56  ;;  %vm1294_vm15 = vcmp.lt.s32.totalorder %v3475_v63, 2  ;;  %v1298_v43 = vsel %vm1296_vm14, %v1286_v10, 2102212464 }
 0x109   : > { %v1301_v31 = vsel %vm1293_vm12, %v1280_v29, %v1283_v40  ;;  %v1302_v0 = vsel %vm1296_vm14, %v1289_v15, 920167782  ;;  %v1309_v48 = vshll.u32 %v1269_v12, 8  ;;  %v1144_v23 = vsel %vm3460_vm9, 0, %v1142_v26 }
 0x10a   : > { %2304 = vset.pattern.permute.xlu1 %v2474_v1  ;;  %v1224_v33 = vsub.s32 0, %v3517_v58  ;;  %v1303_v56 = vsel %vm1295_vm13, %v1286_v10, %v1302_v0  ;;  %v1490_v7 = vsub.f32 0.0, %v305_v49  ;;  %v1305_v57 = vsel %vm1293_vm12, %v1283_v40, %v1286_v10 }
 0x10b   : > { %1717 = vperm.xlu1 %2304, %v1390_v44   ;;  %v1304_v19 = vsel %vm1294_vm15, %v1301_v31, %v1303_v56  ;;  %v1306_v25 = vsel %vm1296_vm14, %v1292_v46, 1326507024  ;;  %v1494_v30 = vsub.s32 0, %v2572_v3  ;;  %v1297_v55 = vsel %vm1293_vm12, %v1277_v22, %v1280_v29  ;;  %v3567_v12 = vpop.permute.xlu1 %1627  ;;  %v3577_v44 = vpop.permute.xlu0 %1436 }
 0x10c   : > { %v2095_v17 = vmin.u32 %v1224_v33, %v3517_v58  ;;  %v1299_v62 = vsel %vm1295_vm13, %v1283_v40, %v1298_v43  ;;  %v1148_v6 = vand.u32 3, %v1144_v23  ;;  %v1307_v5 = vsel %vm1295_vm13, %v1289_v15, %v1306_v25 }
 0x10d   : > { %v3551_v60 = vmul.u32.u64.low %v1309_v48, %v1304_v19  ;;  %v3552_v14 = vmul.u32.u64.high %v1309_v48, %v1304_v19, %v3551_v60  ;;  %v1308_v3 = vsel %vm1294_vm15, %v1305_v57, %v1307_v5  ;;  %v1300_v52 = vsel %vm1294_vm15, %v1297_v55, %v1299_v62 }
 0x10e   : > { %v1226_v45 = vclz %v2095_v17  ;;  %v3564_v32 = vmul.u32.u64.low %v1309_v48, %v1308_v3  ;;  %v3565_v26 = vmul.u32.u64.high %v1309_v48, %v1308_v3, %v3564_v32  ;;  %v3569_v29 = vrot.slane %v1490_v7, %v1494_v30 }
 0x10f   : > { %vm1147_vm0 = vweird.f32 %v3203_v18  ;;  %v1484_v40 = vsub.f32 %v3454_v11, %v3560_v53  ;;  %vm1149_vm1 = vcmp.lt.s32.totalorder %v1148_v6, 2  ;;  %vm1150_vm2 = vcmp.eq.s32.totalorder %v1148_v6, 0  ;;  %v3595_v23 = vpop.permute.xlu0 %1611 }
 0x110   : > { %v2096_v35 = vadd.s32 4294967294, %v1226_v45  ;;  %v1319_v21 = vadd.s32 1, %v3552_v14  ;;  %v1642_v63 = vsub.f32 %v3364_v13, %v3560_v53  ;;  %v1214_v27 = vadd.s32 %v3450_v34, %v3447_v16 }
 0x111   : > { %v1316_v15 = vmul.u32 %v1309_v48, %v1300_v52  ;;  %v1501_v54 = vmul.f32 %v3569_v29, %v1484_v40  ;;  %vm321_vm4 = vcmp.lt.f32.partialorder %v2620_v47, 5.0  ;;  %vm1153_vm5 = vcmp.eq.s32.totalorder %v1148_v6, 2  ;;  %v3593_v48 = vpop.permute.xlu1 %1631 }
 0x112   : > { %vm2097_vm3 = vcmp.lt.s32.totalorder %v2096_v35, 0  ;;  %vm1160_vm6 = vcmp.lt.s32.totalorder %v3311_v4, 0  ;;  %vm1318_vm7 = vc.u32 %v3565_v26, %v3551_v60  ;;  %v1643_v13 = vsub.f32 %v3380_v36, %v3560_v53 }
 0x113   : > { %v2361_v38 = vpop.eup %2360  ;;  %v1229_v11 = vsel %vm2097_vm3, 0, %v2096_v35  ;;  %v1320_v43 = vsel %vm1318_vm7, %v1319_v21, %v3552_v14  ;;  %v1652_v31 = vmul.f32 %v1642_v63, %v3569_v29  ;;  %v1646_v0 = vsub.f32 %v3482_v50, %v3560_v53 }
 0x114   : > { %v2363_v10 = vpop.eup %2362  ;;  %v1154_v46 = vxor.u32 2147483648, %v2361_v38  ;;  %v1230_v16 = vsub.s32 32, %v1229_v11  ;;  %v1231_v34 = vshll.u32 %v3517_v58, %v1229_v11  ;;  %v1234_v49 = vsub.s32 4294967266, %v1229_v11 }
 0x115   : > { %v1151_v22 = vxor.u32 2147483648, %v2363_v10  ;;  %v1321_v7 = vadd.s32 %v1320_v43, %v1316_v15  ;;  %v1244_v19 = vsub.s32 4, %v3497_v41  ;;  %v1653_v57 = vmul.f32 %v1643_v13, %v3569_v29  ;;  %v1467_v3 = vpop.permute.xlu1 %1466 }
 0x116   : > { %v1155_v36 = vsel %vm1153_vm5, %v1154_v46, %v2363_v10  ;;  %v1232_v33 = vshrl.u32 %v1214_v27, %v1230_v16  ;;  %v1235_v56 = vadd.s32 127, %v1234_v49  ;;  %v3601_v25 = vmul.f32 %v1501_v54, %v1484_v40 }
 0x117   : > { %v1152_v58 = vsel %vm1150_vm2, %v2361_v38, %v1151_v22  ;;  %v1322_v55 = vadd.s32 536870912, %v1321_v7  ;;  %v1662_v5 = vmul.f32 %v1652_v31, %v1642_v63  ;;  %v1483_v14 = vsub.f32 %v3401_v61, %v3560_v53  ;;  %v3617_v63 = vpop.permute.xlu0 %1451 }
 0x118   : > { %v1156_v30 = vsel %vm1149_vm1, %v1152_v58, %v1155_v36  ;;  %v1233_v50 = vor.u32 %v1232_v33, %v1231_v34  ;;  %v1236_v17 = vshll.u32 %v1235_v56, 23  ;;  %v1656_v45 = vmul.f32 %v1646_v0, %v3569_v29 }
 0x119   : > { %v1157_v62 = vsel %vm1147_vm0, nan, %v1156_v30  ;;  %v3609_v40 = vshrl.u32 %v1322_v55, 30  ;;  %v1663_v6 = vmul.f32 %v1653_v57, %v1643_v13  ;;  %v1647_v27 = vsub.f32 %v3506_v28, %v3560_v53  ;;  %v1636_v43 = vpop.permute.xlu1 %1635 }
 0x11a   : > { %v1371_v52 = vadd.f32 1.0, %v1157_v62  ;;  %v1237_v32 = vor.u32 4788187, %v1236_v17  ;;  %v1240_v35 = vcvt.s32.f32 %v1233_v50  ;;  %v3611_v21 = vmul.f32 %v1656_v45, %v1646_v0 }
 0x11b   : > { %v1486_v18 = vsub.f32 %v3527_v51, %v3560_v53  ;;  %v3622_v54 = vsel %vm1160_vm6, %v1244_v19, %v3497_v41  ;;  %v1324_v38 = vshll.u32 %v3609_v40, 30  ;;  %v1500_v11 = vmul.f32 %v3569_v29, %v1483_v14 }
 0x11c   : > { %v1381_v61 = vmul.f32 0.5, %v1371_v52  ;;  %v1238_v15 = vand.u32 2147483647, %v1237_v32  ;;  %v1645_v13 = vsub.f32 %v3421_v42, %v3560_v53  ;;  %v1657_v28 = vmul.f32 %v1647_v27, %v3569_v29 }
 0x11d   : > { %v1503_v51 = vmul.f32 %v3569_v29, %v1486_v18  ;;  %v3632_v16 = vsub.s32 %v1321_v7, %v1324_v38  ;;  %v1672_v34 = vmul.f32 1.442695, %v1662_v5  ;;  %v1674_v41 = vmul.f32 1.442695, %v1663_v6  ;;  %v3655_v7 = vpop.permute.xlu0 %1461  ;;  %v1640_v5 = vpop.permute.xlu1 %1639 }
 0x11e   : > { %v1391_v10 = vsel %vm321_vm4, %v1381_v61, 0.0  ;;  %v1241_v46 = vmul.f32 %v1240_v35, %v1238_v15  ;;  %v3634_v49 = vmul.f32 %v1657_v28, %v1647_v27  ;;  %vm3640_vm8 = vcmp.le.f32.partialorder %v1158_v37, 0.7853982 }
 0x11f   : > { %1574 = vperm.xlu0 %2303, %v1391_v10   ;;  %1721 = vperm.xlu1 %2304, %v1391_v10   ;;  %v3636_v22 = vmul.f32 %v1503_v51, %v1486_v18  ;;  %v1327_v31 = vsub.s32 0, %v3632_v16  ;;  %v1480_v0 = vsub.f32 %v3508_v9, %v3560_v53  ;;  %v1247_v36 = vsel %vm3640_vm8, 0, %v3622_v54 }
 0x120   : > { %v1242_v47 = vxor.u32 2147483648, %v1241_v46  ;;  %v1655_v33 = vmul.f32 %v1645_v13, %v3569_v29  ;;  %v1648_v56 = vsub.f32 %v3567_v12, %v3560_v53  ;;  %v1481_v37 = vsub.f32 %v3541_v39, %v3560_v53 }
 0x121   : > { %v2099_v19 = vmin.u32 %v1327_v31, %v3632_v16  ;;  %2364 = vpow2.f32 %v1672_v34  ;;  %v1510_v9 = vmul.f32 %v1500_v11, %v1483_v14  ;;  %v1317_v12 = vadd.s32 %v3551_v60, %v3565_v26  ;;  %v1472_v27 = vpop.permute.xlu0 %1471  ;;  %v3682_v38 = vpop.permute.xlu1 %1544 }
 0x122   : > { %v1243_v58 = vsel %vm1160_vm6, %v1242_v47, %v1241_v46  ;;  %2366 = vpow2.f32 %v1674_v41  ;;  %v1497_v39 = vmul.f32 %v3569_v29, %v1480_v0  ;;  %v1658_v50 = vmul.f32 %v1648_v56, %v3569_v29 }
 0x123   : > { %v1246_v57 = vsel %vm3640_vm8, %v3311_v4, %v1243_v58  ;;  %2305 = vset.pattern.permute.xlu1 %v2475_v2  ;;  %v1329_v30 = vclz %v2099_v19  ;;  %v1498_v17 = vmul.f32 %v3569_v29, %v1481_v37  ;;  %v1649_v62 = vsub.f32 %v3593_v48, %v3560_v53 }
 0x124   : > { %2368 = vcosq.f32 %v1246_v57  ;;  %v1507_v55 = vmul.f32 %v1497_v39, %v1480_v0  ;;  %v1482_v2 = vsub.f32 %v3577_v44, %v3560_v53  ;;  %v1665_v60 = vmul.f32 %v1655_v33, %v1645_v13 }
 0x125   : > { %2370 = vsinq.f32 %v1246_v57  ;;  %v2100_v14 = vadd.s32 4294967294, %v1329_v30  ;;  %v3673_v26 = vmul.f32 %v1658_v50, %v1648_v56  ;;  %v1508_v45 = vmul.f32 %v1498_v17, %v1481_v37  ;;  %v1540_v46 = vpop.permute.xlu0 %1539 }
 0x126   : > { %v1517_v52 = vmul.f32 1.442695, %v1507_v55  ;;  %v1659_v32 = vmul.f32 %v1649_v62, %v3569_v29  ;;  %v1499_v35 = vmul.f32 %v3569_v29, %v1482_v2  ;;  %v1488_v6 = vsub.f32 %v1467_v3, %v3560_v53 }
 0x127   : > { %vm2101_vm9 = vcmp.lt.s32.totalorder %v2100_v14, 0  ;;  %v1523_v18 = vmul.f32 1.442695, %v1510_v9  ;;  %v1519_v48 = vmul.f32 1.442695, %v1508_v45  ;;  %v1644_v44 = vsub.f32 %v3595_v23, %v3560_v53  ;;  %v1698_v9 = vpop.permute.xlu1 %1697 }
 0x128   : > { %v1332_v61 = vsel %vm2101_vm9, 0, %v2100_v14  ;;  %2372 = vpow2.f32 %v1517_v52  ;;  %v3680_v15 = vmul.f32 %v1659_v32, %v1649_v62  ;;  %v1509_v54 = vmul.f32 %v1499_v35, %v1482_v2  ;;  %v2310_v52 = vld [vmem:[%s3892_s3 + $0x18] sm:$0xff]  }
 0x129   : > { %v1333_v11 = vsub.s32 32, %v1332_v61  ;;  %v1334_v13 = vshll.u32 %v3632_v16, %v1332_v61  ;;  %v1337_v28 = vsub.s32 4294967266, %v1332_v61  ;;  %v1678_v51 = vmul.f32 1.442695, %v1665_v60  ;;  %v1694_v55 = vpop.permute.xlu0 %1693 }
 0x12a   : > { %2374 = vpow2.f32 %v1519_v48  ;;  %v1521_v3 = vmul.f32 1.442695, %v1509_v54  ;;  %v1505_v10 = vmul.f32 %v3569_v29, %v1488_v6  ;;  %v1654_v23 = vmul.f32 %v1644_v44, %v3569_v29 }
 0x12b   : > { %v1335_v34 = vshrl.u32 %v1317_v12, %v1333_v11  ;;  %v1338_v41 = vadd.s32 127, %v1337_v28  ;;  %v1650_v42 = vsub.f32 %v1636_v43, %v3560_v53  ;;  %v1251_v47 = vand.u32 3, %v1247_v36  ;;  %v1555_v48 = vpop.permute.xlu1 %1554 }
 0x12c   : > { %2376 = vpow2.f32 %v1523_v18  ;;  %v3688_v31 = vmul.f32 %v1505_v10, %v1488_v6  ;;  %v1651_v0 = vsub.f32 %v1640_v5, %v3560_v53  ;;  %v1664_v56 = vmul.f32 %v1654_v23, %v1644_v44 }
 0x12d   : > { %v1336_v16 = vor.u32 %v1335_v34, %v1334_v13  ;;  %v1339_v33 = vshll.u32 %v1338_v41, 23  ;;  %2378 = vpow2.f32 %v1678_v51  ;;  %v1660_v58 = vmul.f32 %v1650_v42, %v3569_v29 }
 0x12e   : > { %v3691_v37 = vpop.eup %2364  ;;  %2380 = vpow2.f32 %v1521_v3  ;;  %v1661_v19 = vmul.f32 %v1651_v0, %v3569_v29  ;;  %v1676_v12 = vmul.f32 1.442695, %v1664_v56  ;;  %v1487_v39 = vsub.f32 %v3655_v7, %v3560_v53  ;;  %v2308_v7 = vld [vmem:[%s3892_s3 + $0x8] sm:$0xff]   ;;  %v2309_v3 = vld [vmem:[%s3892_s3] sm:$0xff]  }
 0x12f   : > { %v2367_v57 = vpop.eup %2366  ;;  %v1340_v43 = vor.u32 4788187, %v1339_v33  ;;  %v1343_v36 = vcvt.s32.f32 %v1336_v16  ;;  %vm1253_vm10 = vcmp.eq.s32.totalorder %v1251_v47, 0  ;;  %vm1256_vm11 = vcmp.eq.s32.totalorder %v1251_v47, 2 }
 0x130   : > { %v3697_v50 = vmul.f32 %v1660_v58, %v1650_v42  ;;  %v3699_v17 = vmul.f32 %v1661_v19, %v1651_v0  ;;  %2382 = vpow2.f32 %v1676_v12  ;;  %v1504_v14 = vmul.f32 %v3569_v29, %v1487_v39 }
 0x131   : > { %v2369_v30 = vpop.eup %2368  ;;  %v1341_v5 = vand.u32 2147483647, %v1340_v43  ;;  %vm1252_vm12 = vcmp.lt.s32.totalorder %v1251_v47, 2  ;;  %v1489_v45 = vsub.f32 %v1472_v27, %v3560_v53  ;;  %vm1250_vm13 = vweird.f32 %v3311_v4 }
 0x132   : > { %v2371_v62 = vpop.eup %2370  ;;  %v1257_v2 = vxor.u32 2147483648, %v2369_v30  ;;  %v3710_v6 = vmul.f32 %v1504_v14, %v1487_v39  ;;  %vm1263_vm14 = vcmp.lt.s32.totalorder %v3349_v20, 0  ;;  %vm3717_vm15 = vcmp.le.f32.partialorder %v1261_v24, 0.7853982  ;;  %v2311_v24 = vld [vmem:[%s3892_s3 + $0x10] sm:$0xff]  }
 0x133   : > { %v1254_v60 = vxor.u32 2147483648, %v2371_v62  ;;  %v1344_v35 = vmul.f32 %v1343_v36, %v1341_v5  ;;  %v1506_v27 = vmul.f32 %v3569_v29, %v1489_v45  ;;  %v2482_v11 = vmov 0.0  }
 0x134   : > { %v1258_v32 = vsel %vm1256_vm11, %v1257_v2, %v2371_v62  ;;  %2164 = vmatprep.subr.bf16.mxu1 %v2482_v11  ;;  %2140 = vmatprep.subr.bf16.mxu0 %v2482_v11  ;;  %v1550_v10 = vpop.permute.xlu0 %1549  ;;  %vm322_vm0 = vcmp.lt.f32.partialorder %v2639_v8, 5.0  ;;  %vm2483_vm1 = vmmov 0   ;;  %v1733_v0 = vmul.f32 %v2367_v57, %v1698_v9 }
 0x135   : > { %v1255_v18 = vsel %vm1253_vm10, %v2369_v30, %v1254_v60  ;;  %v2373_v44 = vpop.eup %2372  ;;  %v1345_v4 = vxor.u32 2147483648, %v1344_v35  ;;  %v3723_v28 = vmul.f32 %v1506_v27, %v1489_v45  ;;  %2165 = vmatpush3.bf16.msra.mxu1 %v2308_v7  ;;  %2141 = vmatpush3.bf16.msra.mxu0 %v2310_v52  ;;  %v1732_v56 = vmul.f32 %v3691_v37, %v1694_v55 }
 0x136   : > { %v1259_v61 = vsel %vm1252_vm12, %v1255_v18, %v1258_v32  ;;  %v1587_v51 = vmul.f32 %v2373_v44, %v1540_v46  ;;  %2166 = vmatprep.subr.bf16.mxu1 %v2482_v11  ;;  %2142 = vmatprep.subr.bf16.mxu0 %v2482_v11  ;;  %v1347_v46 = vsub.s32 4, %v3609_v40  ;;  %vm1759_vm2 = vcmask 261120  }
 0x137   : > { %v1260_v13 = vsel %vm1250_vm13, nan, %v1259_v61  ;;  %v2375_v34 = vpop.eup %2374  ;;  %v1346_v23 = vsel %vm1263_vm14, %v1345_v4, %v1344_v35  ;;  %2168 = vmatprep.mubr.msk.bf16.mxu1 %vm2483_vm1, %v2482_v11  ;;  %2144 = vmatprep.mubr.msk.bf16.mxu0 %vm2483_vm1, %v2482_v11  ;;  %v1742_v9 = vpack.c.bf16 %v1733_v0, %v1732_v56  ;;  %vm1353_vm6 = vweird.f32 %v3349_v20 }
 0x138   : > { %v1372_v41 = vadd.f32 1.0, %v1260_v13  ;;  %v1349_v42 = vsel %vm3717_vm15, %v3349_v20, %v1346_v23  ;;  %v1588_v47 = vmul.f32 %v2375_v34, %v3682_v38  ;;  %v1706_v38 = vpop.permute.xlu1 %1705  ;;  %v1348_v57 = vsel %vm1263_vm14, %v1347_v46, %v3609_v40 }
 0x139   : > { %v2377_v16 = vpop.eup %2376  ;;  %2384 = vcosq.f32 %v1349_v42  ;;  %2167 = vmatpush3.bf16.msra.mxu1 %v2309_v3  ;;  %2143 = vmatpush3.bf16.msra.mxu0 %v2311_v24  ;;  %v1702_v12 = vpop.permute.xlu0 %1701  ;;  %v1350_v8 = vsel %vm3717_vm15, 0, %v1348_v57  ;;  %v1485_v35 = vsub.f32 %v3617_v63, %v3560_v53  ;;  %vm323_vm7 = vcmp.lt.f32.partialorder %v2632_v59, 5.0 }
 0x13a   : > { %v1382_v33 = vmul.f32 0.5, %v1372_v41  ;;  %v2379_v58 = vpop.eup %2378  ;;  %2386 = vsinq.f32 %v1349_v42  ;;  %v1597_v19 = vpack.c.bf16 %v1588_v47, %v1587_v51  ;;  %v1590_v37 = vmul.f32 %v2377_v16, %v1555_v48 }
 0x13b   : > { %v2381_v43 = vpop.eup %2380  ;;  %v1735_v30 = vmul.f32 %v2379_v58, %v1706_v38  ;;  %v1354_v5 = vand.u32 3, %v1350_v8  ;;  %v1502_v44 = vmul.f32 %v3569_v29, %v1485_v35  ;;  %v1525_v20 = vmul.f32 1.442695, %v3601_v25 }
 0x13c   : > { %v1392_v36 = vsel %vm322_vm0, %v1382_v33, 0.0  ;;  %2169 = vmatmul.mubr.msk.bf16.vlgmr.msra.gmra.mxu1 %vm1759_vm2, %v1597_v19  ;;  %2145 = vmatmul.mubr.msk.bf16.vlgmr.msra.gmra.mxu0 %vm1759_vm2, %v1742_v9  ;;  %v1589_v39 = vmul.f32 %v2381_v43, %v1550_v10  ;;  %v1682_v53 = vmul.f32 1.442695, %v3634_v49  ;;  %v1680_v63 = vmul.f32 1.442695, %v3611_v21 }
 0x13d   : > { %1579 = vperm.xlu0 %2303, %v1392_v36   ;;  %v2383_v55 = vpop.eup %2382  ;;  %2172 = vmatprep.mubr.msk.bf16.mxu1 %vm2483_vm1, %v2482_v11  ;;  %vm1359_vm3 = vcmp.eq.s32.totalorder %v1354_v5, 2  ;;  %vm1356_vm4 = vcmp.eq.s32.totalorder %v1354_v5, 0  ;;  %vm1355_vm5 = vcmp.lt.s32.totalorder %v1354_v5, 2  ;;  %v1512_v4 = vmul.f32 %v1502_v44, %v1485_v35  ;;  %v3803_v35 = vld [vmem:[%s3893_s4] ss:$0 sm:$0xff] }
 0x13e   : > { %2148 = vmatprep.mubr.msk.bf16.mxu0 %vm2483_vm1, %v2482_v11  ;;  %v1734_v62 = vmul.f32 %v2383_v55, %v1702_v12  ;;  %v1598_v40 = vpack.c.bf16 %v1590_v37, %v1589_v39  ;;  %v1529_v42 = vmul.f32 1.442695, %v3636_v22  ;;  %v1684_v47 = vmul.f32 1.442695, %v3673_v26 }
 0x13f   : > { %v1527_v13 = vmul.f32 1.442695, %v1512_v4  ;;  %v1686_v0 = vmul.f32 1.442695, %v3680_v15  ;;  %v1531_v16 = vmul.f32 1.442695, %v3710_v6 }
 0x140   : > { %v1743_v2 = vpack.c.bf16 %v1735_v30, %v1734_v62  ;;  %v1533_v6 = vmul.f32 1.442695, %v3688_v31  ;;  %v1535_v39 = vmul.f32 1.442695, %v3723_v28  ;;  %v1688_v30 = vmul.f32 1.442695, %v3697_v50 }
 0x141   : > { %2306 = vset.pattern.permute.xlu0 %v2474_v1  ;;  %2388 = vpow2.f32 %v1527_v13  ;;  %v1690_v55 = vmul.f32 1.442695, %v3699_v17 }
 0x142   : > { %1725 = vperm.xlu0 %2306, %v1392_v36   ;;  %2390 = vpow2.f32 %v1525_v20 }
 0x143   : > { %2392 = vpow2.f32 %v1682_v53 }
 0x144   : > { %2173 = vmatmul.mubr.msk.bf16.gmra.mxu1 %vm1759_vm2, %v1598_v40  ;;  %2149 = vmatmul.mubr.msk.bf16.gmra.mxu0 %vm1759_vm2, %v1743_v2  ;;  %2394 = vpow2.f32 %v1680_v63 }
 0x145   : > { %2176 = vmatprep.mubr.msk.bf16.mxu1 %vm2483_vm1, %v2482_v11  ;;  %2152 = vmatprep.mubr.msk.bf16.mxu0 %vm2483_vm1, %v2482_v11  ;;  %2396 = vpow2.f32 %v1529_v42 }
 0x146   : > { %v2385_v14 = vpop.eup %2384  ;;  %2398 = vpow2.f32 %v1684_v47 }
 0x147   : > { %v2387_v60 = vpop.eup %2386  ;;  %v1360_v45 = vxor.u32 2147483648, %v2385_v14  ;;  %2400 = vpow2.f32 %v1686_v0 }
 0x148   : > { %v1357_v7 = vxor.u32 2147483648, %v2387_v60  ;;  %2402 = vpow2.f32 %v1531_v16 }
 0x149   : > { %v1361_v52 = vsel %vm1359_vm3, %v1360_v45, %v2387_v60  ;;  %2404 = vpow2.f32 %v1533_v6 }
 0x14a   : > { %v1358_v32 = vsel %vm1356_vm4, %v2385_v14, %v1357_v7  ;;  %2406 = vpow2.f32 %v1535_v39 }
 0x14b   : > { %v1362_v18 = vsel %vm1355_vm5, %v1358_v32, %v1361_v52  ;;  %2408 = vpow2.f32 %v1688_v30 }
 0x14c   : > { %v1363_v27 = vsel %vm1353_vm6, nan, %v1362_v18  ;;  %2410 = vpow2.f32 %v1690_v55 }
 0x14d   : > { %v1373_v48 = vadd.f32 1.0, %v1363_v27 }
 0x14e   : > { %v2389_v29 = vpop.eup %2388 }
 0x14f   : > { %v1383_v61 = vmul.f32 0.5, %v1373_v48  ;;  %v1565_v59 = vpop.permute.xlu1 %1564  ;;  %v2391_v3 = vpop.eup %2390 }
 0x150   : > { %v1592_v51 = vmul.f32 %v2389_v29, %v1565_v59  ;;  %v2393_v34 = vpop.eup %2392 }
 0x151   : > { %v1393_v54 = vsel %vm323_vm7, %v1383_v61, 0.0  ;;  %v2395_v25 = vpop.eup %2394 }
 0x152   : > { %1584 = vperm.xlu1 %2305, %v1393_v54   ;;  %v2397_v58 = vpop.eup %2396 }
 0x153   : > { %v2399_v19 = vpop.eup %2398 }
 0x154   : > { %v2401_v38 = vpop.eup %2400 }
 0x155   : > { %v2403_v36 = vpop.eup %2402 }
 0x156   : > { %2307 = vset.pattern.permute.xlu1 %v2474_v1  ;;  %v1714_v1 = vpop.permute.xlu1 %1713  ;;  %v2405_v62 = vpop.eup %2404 }
 0x157   : > { %1729 = vperm.xlu1 %2307, %v1393_v54   ;;  %v1737_v23 = vmul.f32 %v2393_v34, %v1714_v1  ;;  %v2407_v40 = vpop.eup %2406 }
 0x158   : > { %v2409_v31 = vpop.eup %2408 }
 0x159   : > { %v2411_v45 = vpop.eup %2410 }
 0x16a   : > { %v1560_v24 = vpop.permute.xlu0 %1559 }
 0x16b   : > { %v1591_v10 = vmul.f32 %v2391_v3, %v1560_v24 }
 0x16d   : > { %v1599_v41 = vpack.c.bf16 %v1592_v51, %v1591_v10 }
 0x16f   : > { %2177 = vmatmul.mubr.msk.bf16.gmra.mxu1 %vm1759_vm2, %v1599_v41  ;;  %v1710_v49 = vpop.permute.xlu0 %1709 }
 0x170   : > { %v1736_v46 = vmul.f32 %v2395_v25, %v1710_v49  ;;  %2180 = vmatprep.mubr.msk.bf16.mxu1 %vm2483_vm1, %v2482_v11 }
 0x172   : > { %v1744_v21 = vpack.c.bf16 %v1737_v23, %v1736_v46 }
 0x174   : > { %2153 = vmatmul.mubr.msk.bf16.gmra.mxu0 %vm1759_vm2, %v1744_v21 }
 0x175   : > { %2156 = vmatprep.mubr.msk.bf16.mxu0 %vm2483_vm1, %v2482_v11 }
 0x181   : > { %v1570_v33 = vpop.permute.xlu1 %1569 }
 0x182   : > { %v1593_v43 = vmul.f32 %v2397_v58, %v1570_v33 }
 0x186   : > { %v1718_v56 = vpop.permute.xlu1 %1717 }
 0x187   : > { %v1738_v12 = vmul.f32 %v2399_v19, %v1718_v56 }
 0x19a   : > { %v1575_v9 = vpop.permute.xlu0 %1574  ;;  %v1722_v57 = vpop.permute.xlu1 %1721 }
 0x19b   : > { %v1594_v22 = vmul.f32 %v2403_v36, %v1575_v9  ;;  %v1739_v26 = vmul.f32 %v2401_v38, %v1722_v57 }
 0x19d   : > { %v1600_v37 = vpack.c.bf16 %v1594_v22, %v1593_v43  ;;  %v1745_v15 = vpack.c.bf16 %v1739_v26, %v1738_v12 }
 0x19f   : > { %2181 = vmatmul.mubr.msk.bf16.gmra.mxu1 %vm1759_vm2, %v1600_v37  ;;  %2157 = vmatmul.mubr.msk.bf16.gmra.mxu0 %vm1759_vm2, %v1745_v15 }
 0x1a0   : > { %2184 = vmatprep.mubr.msk.bf16.mxu1 %vm2483_vm1, %v2482_v11  ;;  %2160 = vmatprep.mubr.msk.bf16.mxu0 %vm2483_vm1, %v2482_v11 }
 0x1b8   : > { %v1580_v8 = vpop.permute.xlu0 %1579 }
 0x1b9   : > { %v1595_v5 = vmul.f32 %v2405_v62, %v1580_v8 }
 0x1bd   : > { %v1726_v11 = vpop.permute.xlu0 %1725 }
 0x1be   : > { %v1740_v50 = vmul.f32 %v2409_v31, %v1726_v11 }
 0x1cd   : > { %v1585_v2 = vpop.permute.xlu1 %1584 }
 0x1ce   : > { %v1596_v14 = vmul.f32 %v2407_v40, %v1585_v2 }
 0x1d0   : > { %v1601_v60 = vpack.c.bf16 %v1596_v14, %v1595_v5 }
 0x1d2   : > { %v1730_v28 = vpop.permute.xlu1 %1729  ;;  %2185 = vmatmul.mubr.msk.bf16.gmra.mxu1 %vm1759_vm2, %v1601_v60 }
 0x1d3   : > { %v1741_v7 = vmul.f32 %v2411_v45, %v1730_v28 }
 0x1d5   : > { %v1746_v52 = vpack.c.bf16 %v1741_v7, %v1740_v50 }
 0x1d7   : > { %2161 = vmatmul.mubr.msk.bf16.gmra.mxu0 %vm1759_vm2, %v1746_v52 }
 0x1fc   : > { %v1909_v17 = vpop.f32.mrf.mxu1  ;;  %v1809_v32 = vpop.f32.mrf.mxu0 }
 0x1fd   : > { %v1910_v18 = vadd.f32 %v1909_v17, %v1809_v32 }
 0x1fe   : > { %v2170_v27 = vpop.f32.mrf.mxu1  ;;  %v2146_v48 = vpop.f32.mrf.mxu0 }
 0x1ff   : > { %v1955_v44 = vadd.f32 %v3803_v35, %v1910_v18 }
 0x200   : > { %v1912_v61 = vpop.f32.mrf.mxu1  ;;  %v1812_v54 = vpop.f32.mrf.mxu0 }
 0x201   : > { %1965 = vst [vmem:[%s3806_s13] sm:$0xff] %v1955_v44  ;;  %v1913_v4 = vadd.f32 %v1912_v61, %v1812_v54 }
 0x202   : > { %v2171_v13 = vpop.f32.mrf.mxu1  ;;  %v2147_v20 = vpop.f32.mrf.mxu0 }
 0x203   : > { %v1956_v53 = vadd.f32 %v3803_v35, %v1913_v4 }
 0x204   : > { %v1917_v63 = vpop.f32.mrf.mxu1  ;;  %v1817_v59 = vpop.f32.mrf.mxu0 }
 0x205   : > { %1966 = vst [vmem:[%s3806_s13 + $0x8] sm:$0xff] %v1956_v53  ;;  %v1918_v29 = vadd.f32 %v1917_v63, %v1817_v59 }
 0x206   : > { %v2174_v51 = vpop.f32.mrf.mxu1  ;;  %v2150_v3 = vpop.f32.mrf.mxu0 }
 0x207   : > { %v1957_v24 = vadd.f32 %v3803_v35, %v1918_v29 }
 0x208   : > { %v1920_v10 = vpop.f32.mrf.mxu1  ;;  %v1820_v1 = vpop.f32.mrf.mxu0 }
 0x209   : > { %1967 = vst [vmem:[%s3806_s13 + $0x10] sm:$0xff] %v1957_v24  ;;  %v1921_v34 = vadd.f32 %v1920_v10, %v1820_v1 }
 0x20a   : > { %v2175_v41 = vpop.f32.mrf.mxu1  ;;  %v2151_v23 = vpop.f32.mrf.mxu0 }
 0x20b   : > { %v1958_v25 = vadd.f32 %v3803_v35, %v1921_v34 }
 0x20d   : > { %1968 = vst [vmem:[%s3806_s13 + $0x18] sm:$0xff] %v1958_v25 }
 0x22f   : > { %v1925_v49 = vpop.f32.mrf.mxu1 }
 0x231   : > { %v2178_v46 = vpop.f32.mrf.mxu1 }
 0x233   : > { %v1928_v21 = vpop.f32.mrf.mxu1 }
 0x234   : > { %v1825_v42 = vpop.f32.mrf.mxu0 }
 0x235   : > { %v1926_v47 = vadd.f32 %v1925_v49, %v1825_v42  ;;  %v2179_v0 = vpop.f32.mrf.mxu1 }
 0x236   : > { %v2154_v16 = vpop.f32.mrf.mxu0 }
 0x237   : > { %v1959_v33 = vadd.f32 %v3803_v35, %v1926_v47 }
 0x238   : > { %v1828_v56 = vpop.f32.mrf.mxu0 }
 0x239   : > { %1969 = vst [vmem:[%s3806_s13 + $0x20] sm:$0xff] %v1959_v33  ;;  %v1929_v58 = vadd.f32 %v1928_v21, %v1828_v56 }
 0x23a   : > { %v2155_v19 = vpop.f32.mrf.mxu0 }
 0x23b   : > { %v1960_v38 = vadd.f32 %v3803_v35, %v1929_v58 }
 0x23d   : > { %1970 = vst [vmem:[%s3806_s13 + $0x28] sm:$0xff] %v1960_v38 }
 0x25f   : > { %v1933_v43 = vpop.f32.mrf.mxu1  ;;  %v1833_v36 = vpop.f32.mrf.mxu0 }
 0x260   : > { %v1934_v9 = vadd.f32 %v1933_v43, %v1833_v36 }
 0x261   : > { %v2182_v57 = vpop.f32.mrf.mxu1  ;;  %v2158_v22 = vpop.f32.mrf.mxu0 }
 0x262   : > { %v1961_v12 = vadd.f32 %v3803_v35, %v1934_v9 }
 0x263   : > { %v1936_v26 = vpop.f32.mrf.mxu1  ;;  %v1836_v37 = vpop.f32.mrf.mxu0 }
 0x264   : > { %1971 = vst [vmem:[%s3806_s13 + $0x30] sm:$0xff] %v1961_v12  ;;  %v1937_v15 = vadd.f32 %v1936_v26, %v1836_v37 }
 0x265   : > { %v2183_v6 = vpop.f32.mrf.mxu1  ;;  %v2159_v39 = vpop.f32.mrf.mxu0 }
 0x266   : > { %v1962_v30 = vadd.f32 %v3803_v35, %v1937_v15 }
 0x268   : > { %1972 = vst [vmem:[%s3806_s13 + $0x38] sm:$0xff] %v1962_v30 }
 0x292   : > { %v1941_v55 = vpop.f32.mrf.mxu1 }
 0x294   : > { %v2186_v8 = vpop.f32.mrf.mxu1 }
 0x296   : > { %v1944_v62 = vpop.f32.mrf.mxu1 }
 0x297   : > { %v1841_v40 = vpop.f32.mrf.mxu0 }
 0x298   : > { %v1942_v2 = vadd.f32 %v1941_v55, %v1841_v40  ;;  %v2187_v5 = vpop.f32.mrf.mxu1 }
 0x299   : > { %v2162_v14 = vpop.f32.mrf.mxu0 }
 0x29a   : > { %v1963_v11 = vadd.f32 %v3803_v35, %v1942_v2 }
 0x29b   : > { %v1844_v60 = vpop.f32.mrf.mxu0 }
 0x29c   : > { %1973 = vst [vmem:[%s3806_s13 + $0x40] sm:$0xff] %v1963_v11  ;;  %v1945_v31 = vadd.f32 %v1944_v62, %v1844_v60  ;;  %1982 = sbr.rel (!%p2555_p5) target bundleno = 700 (0x2bc), region = 44 }
 0x29d   : > { %v2163_v45 = vpop.f32.mrf.mxu0 }
 0x29e   : > { %v1964_v28 = vadd.f32 %v3803_v35, %v1945_v31 }
 0x2a0   : > { %1974 = vst [vmem:[%s3806_s13 + $0x48] sm:$0xff] %v1964_v28 }
 0x2a1   : > { %s3922_s15 = smov (!%p1985_p11, %s1984_s15), 10 }
 0x2a2   : > { %s3834_s16 = sshll.u32 %s3922_s15, 7 }
 0x2a3   : > { %s1989_s17 = ssub.s32 1280, %s3834_s16 }
 0x2a4   : > { %1990 = vsyncadd %s3829_s14, %s1989_s17  ;;  %p2119_p12 = scmp.ne.s32.totalorder %s3834_s16, 0  ;;  %s2125_s23 = smul.u32 1280, %s2538_s22 }
 0x2a5   : > { %s1995_s25 = sshll.u32 %s3806_s13, 4  ;;  %s2484_s7 = smov [#allocation2]   ;;  %s3846_s25 = int_to_ptr.vmem [resolvable:$true] %s1995_s25 }
 0x2a6   : > { %s3844_s6 = scalar_lea.hbm %s3894_s5, %s2125_s23  ;;  %s2412_s30 = scalar_lea.vmem %s3846_s25, %s3834_s16 }
 0x2a7   : > { %p2413_p13 = scmp.ne.s32.totalorder %s3846_s25, %s2412_s30  ;;  %s2416_s8 = sshll.u32 %s2484_s7, 4  ;;  %s2417_s8 = int_to_ptr.vmem [resolvable:$false] %s2416_s8 }
 0x2a8   : > { %s2418_s22 = scalar_lea.vmem %s2417_s8, 2560  ;;  %p2419_p2 = scmp.lt.s32.totalorder %s3846_s25, %s2417_s8 }
 0x2a9   : > { %p2414_p0 = pnand %p2413_p13, %p2119_p12  ;;  %p2420_p3 = scmp.lt.s32.totalorder %s2418_s22, %s2412_s30 }
 0x2ab   : > { %p2415_p1 = pneg %p2414_p0  ;;  %p2421_p4 = por %p2420_p3, %p2419_p2 }
 0x2ad   : > { %p2422_p5 = pnand %p2421_p4, %p2415_p1 }
 0x2af   : > { %2425 = shalt.err (!%p2422_p5)
}
 0x2b0   : > { %s2426_s9 = scalar_lea.hbm %s3844_s6, %s3834_s16  ;;  %s2430_s12 = scalar_lea.hbm %s3894_s5, 2432 }
 0x2b1   : > { %p2427_p7 = scmp.ne.s32.totalorder %s3844_s6, %s2426_s9  ;;  %p2431_p10 = scmp.lt.s32.totalorder %s3844_s6, %s3894_s5 }
 0x2b2   : > { %p2432_p11 = scmp.lt.s32.totalorder %s2430_s12, %s2426_s9 }
 0x2b3   : > { %p2428_p8 = pnand %p2427_p7, %p2119_p12 }
 0x2b4   : > { %p2433_p13 = por %p2432_p11, %p2431_p10 }
 0x2b5   : > { %p2429_p9 = pneg %p2428_p8 }
 0x2b7   : > { %p2434_p0 = pnand %p2433_p13, %p2429_p9 }
 0x2b9   : > { %2437 = shalt.err (!%p2434_p0)
}
 0x2ba   : > { %s2485_s17 = smov 128   ;;  %s2486_s23 = smov 8  }
 0x2bb   : > { %2001 = dma.vmem_to_hbm [thread:$0]  (%p2119_p12), %s3846_s25, %s3834_s16, %s3844_s6, %s3829_s14, %s2485_s17, %s2485_s17, %s2486_s23  }
 0x2bc PF: > { %p2234_p1 = scmp.ge.s32.totalorder %s2472_s21, 2  ;;  %s2010_s28 = sand.u32 1, %s2460_s18  }
 0x2bd   : > { %s2011_s26 = scalar_lea.sflag [#allocation3], %s2010_s28 }
 0x2be   : > { %p2231_p2 = pnand %p2234_p1, %p2559_p6 }
 0x2c0   : > { %p2232_p3 = pneg %p2231_p2 }
 0x2c2   : > { %2455 = dma.done.wait (%p2232_p3), %s2011_s26, 1280  }
 0x2c3   : > { %2457 = vsyncadd (%p2232_p3), %s2011_s26, 4294966016  ;;  %p15_p4 = scmp.ge.s32.totalorder %s2542_s24, 4   ;;  %s3917_s18 = smov %s2464_s19 }
 0x2c4   : > { %s3918_s19 = smov %s2468_s20  ;;  %s3919_s20 = smov %s2553_s27 }
 0x2c5   : > { %s3920_s21 = smov %s2542_s24  ;;  %17 = sbr.rel (!%p15_p4) target bundleno = 3 (0x3), region = 75 }
 0x2ca   :  { %2016 = vsyncpa [#allocation3], 1 }
 0x2cb   :  { %2018 = vsyncpa [#allocation3 + $0x1], 1 }

</bundles_post_ra>
